<compile_context>
chip_gen: v7x
topology: tpu7x:2x2x1
jax: 0.10.0
libtpu: 0.0.40
codegen_flags: <defaults>
</compile_context>

<pallas_src>
import functools

import jax
import jax.numpy as jnp
from jax import lax
from jax.experimental import pallas as pl
from jax.experimental.pallas import tpu as pltpu

THETA = 0.7        # module default; != 0 so forward takes the gradient branch
FAST_MATH = True   # EUP reciprocal/rsqrt + polynomial arctan; False = exact ops

# Sobel kernels (same as spatial_gradient_x / spatial_gradient_y).
SOBEL_X = ((-1.0, 0.0, 1.0),
           (-2.0, 0.0, 2.0),
           (-1.0, 0.0, 1.0))
SOBEL_Y = ((1.0, 2.0, 1.0),
           (0.0, 0.0, 0.0),
           (-1.0, -2.0, -1.0))

_HALF_PI = 1.5707963267948966
# Odd minimax polynomial for atan(t) on t in [0, 1]; max abs error ~2e-6.
_ATAN_COEFFS = (-0.01172120, 0.05265332, -0.11643287,
                0.19354346, -0.33262347, 0.99997726)


def _atan_poly01(t):
    """atan(t) for t in [0, 1] via Horner on an odd minimax polynomial."""
    t2 = t * t
    p = _ATAN_COEFFS[0]
    for c in _ATAN_COEFFS[1:]:
        p = p * t2 + c
    return t * p


def _gabor_kernel(x_ref, o_ref, pad_ref, *, H, W, fast):
    """Per grid step: a block of P planes in, P gradient-gabor planes out.

    x_ref:   (P, H, W)      input planes (VMEM)
    o_ref:   (P, H, W)      arctan(sqrt((gx/(x+eps))^2 + (gy/(x+eps))^2))
    pad_ref: (P, H+2, W+2)  VMEM scratch; only rows 0 / H+1 are zeroed, the
                            interior holds x at offset (1,1), the left/right
                            halo columns are garbage and masked on load.
    """
    P = x_ref.shape[0]
    x = x_ref[...]                                    # single read of the tile

    # Zero only the top/bottom halo rows (cheap strips), every step: scratch is
    # per-core, so a program_id==0 gate would break under megacore sharding.
    zrow = jnp.zeros((P, 1, W + 2), jnp.float32)
    pad_ref[:, 0:1, :] = zrow
    pad_ref[:, H + 1:H + 2, :] = zrow
    pad_ref[:, 1:H + 1, 1:W + 1] = x                  # interior at (1, 1) offset

    # Column (lane) taps; mask the never-zeroed halo columns with a select.
    lane = lax.broadcasted_iota(jnp.int32, (1, 1, W), 2)
    c0 = jnp.where(lane > 0, pad_ref[:, :, 0:W], 0.0)          # x(:, j-1)
    c1 = pad_ref[:, :, 1:W + 1]                                 # x(:, j)
    c2 = jnp.where(lane < W - 1, pad_ref[:, :, 2:W + 2], 0.0)   # x(:, j+1)

    # Separable Sobel: column pass then row pass.
    #   Sobel_x = [1,2,1]^T (rows) x [-1,0,1] (cols)
    #   Sobel_y = [1,0,-1]^T (rows) x [ 1,2,1] (cols)
    smooth_w = c0 + 2.0 * c1 + c2                               # (P, H+2, W)
    diff_w = c2 - c0                                            # (P, H+2, W)
    gx = diff_w[:, 0:H, :] + 2.0 * diff_w[:, 1:H + 1, :] + diff_w[:, 2:H + 2, :]
    gy = smooth_w[:, 0:H, :] - smooth_w[:, 2:H + 2, :]

    if fast:
        inv = pl.reciprocal(x + 0.001, approx=True)             # EUP
    else:
        inv = 1.0 / (x + 0.001)
    div_x = gx * inv
    div_y = gy * inv
    mag2 = div_x * div_x + div_y * div_y

    if fast:
        # sqrt and arctan mostly on the EUP:
        #   r = sqrt(mag2) = mag2 * rsqrt(mag2); atan(r) = pi/2 - atan(1/r)
        #   for r > 1, and 1/r is exactly the rsqrt we already have.
        inv_r = lax.rsqrt(mag2 + 1e-30)
        r = mag2 * inv_r                                        # 0 when mag2 == 0
        big = mag2 > 1.0
        t = jnp.where(big, inv_r, r)                            # t in [0, 1]
        at = _atan_poly01(t)
        o_ref[...] = jnp.where(big, _HALF_PI - at, at)
    else:
        o_ref[...] = jnp.arctan(jnp.sqrt(mag2))


def _vmem_capacity_bytes(default=64 * 1024 * 1024):
    """Physical VMEM of the local chip; conservative fallback if unknown."""
    try:
        info = pltpu.get_tpu_info()
        cap = getattr(info, "vmem_capacity_bytes", None)
        if cap:
            return int(cap)
    except Exception:
        pass
    return default


def conv2d_res_forward(x, theta=THETA):
    """Replicates Conv2d_res.forward.

    x: (N, C, H, W) -> (gradient_gabor, out_normal) for theta != 0, else x.
    """
    x = x.astype(jnp.float32)
    if abs(theta - 0.0) < 1e-8:
        return x

    N, C, H, W = x.shape
    nc = N * C
    planes = x.reshape(nc, H, W)        # metadata-only reshape, no HBM copy

    # Block sizing: large blocks amortize the ~0.35us per-grid-step overhead.
    # Per-step VMEM footprint is roughly 10-12x the input block (double-
    # buffered in/out, padded scratch, stencil temporaries), so ~6 MiB blocks
    # fit under a 96 MiB limit on 128-MiB-VMEM chips (v5e/v6e) and ~3 MiB
    # blocks under 48 MiB on v7x (64 MiB physical) / unknown chips.
    cap = _vmem_capacity_bytes()
    if cap >= 100 * 1024 * 1024:
        target_bytes, vmem_limit = 6 * 1024 * 1024, 96 * 1024 * 1024
    else:
        target_bytes, vmem_limit = 3 * 1024 * 1024, 48 * 1024 * 1024

    plane_bytes = H * W * 4
    p_blk = int(min(nc, max(1, target_bytes // plane_bytes)))
    # Ragged last block is fine: planes are independent and OOB writes are
    # masked; garbage planes never feed any cross-plane reduction.
    grid = (pl.cdiv(nc, p_blk),)

    kernel = functools.partial(_gabor_kernel, H=H, W=W, fast=FAST_MATH)
    gabor = pl.pallas_call(
        kernel,
        out_shape=jax.ShapeDtypeStruct((nc, H, W), jnp.float32),
        grid_spec=pltpu.PrefetchScalarGridSpec(
            num_scalar_prefetch=0,
            grid=grid,
            in_specs=[pl.BlockSpec((p_blk, H, W), lambda i: (i, 0, 0))],
            out_specs=pl.BlockSpec((p_blk, H, W), lambda i: (i, 0, 0)),
            scratch_shapes=[pltpu.VMEM((p_blk, H + 2, W + 2), jnp.float32)],
        ),
        compiler_params=pltpu.CompilerParams(
            dimension_semantics=("parallel",),
            vmem_limit_bytes=vmem_limit,
        ),
    )(planes)

    gradient_gabor = gabor.reshape(N, C, H, W)
    out_normal = x
    return gradient_gabor, out_normal


def _reference(x):
    """Pure-JAX reference of the same forward pass, for sanity checking."""
    N, C, H, W = x.shape
    xp = jnp.pad(x, ((0, 0), (0, 0), (1, 1), (1, 1)))
    gx = jnp.zeros_like(x)
    gy = jnp.zeros_like(x)
    for ki in range(3):
        for kj in range(3):
            win = xp[:, :, ki:ki + H, kj:kj + W]
            gx = gx + SOBEL_X[ki][kj] * win
            gy = gy + SOBEL_Y[ki][kj] * win
    div_x = (gx / (x + 0.001)) ** 2
    div_y = (gy / (x + 0.001)) ** 2
    return jnp.arctan(jnp.sqrt(div_x + div_y)), x


if __name__ == "__main__":
    key = jax.random.PRNGKey(0)
    N, C, H, W = 2, 4, 16, 16
    x = jax.random.normal(key, (N, C, H, W), dtype=jnp.float32)

    gabor, out_normal = conv2d_res_forward(x)
    gabor = jax.block_until_ready(gabor)
    out_normal = jax.block_until_ready(out_normal)

    ref_gabor, ref_normal = _reference(x)
    assert gabor.shape == (N, C, H, W)
    assert out_normal.shape == (N, C, H, W)
    tol = 5e-3 if FAST_MATH else 1e-5
    assert jnp.allclose(gabor, ref_gabor, atol=tol, rtol=tol), (
        "max abs diff = %f" % float(jnp.max(jnp.abs(gabor - ref_gabor))))
    assert jnp.allclose(out_normal, ref_normal)

    print("KERNEL_OK")
</pallas_src>

<mosaic_0001>
module attributes {stable_mosaic.version = 11 : i64} {
  func.func @_gabor_kernel(%arg0: i32, %arg1: memref<8x16x16xf32, #tpu.memory_space<vmem>>, %arg2: memref<8x16x16xf32, #tpu.memory_space<vmem>>, %arg3: memref<8x18x18xf32, #tpu.memory_space<vmem>>) attributes {dimension_semantics = [#tpu.dimension_semantics<parallel>], iteration_bounds = array<i64: 1>, scalar_prefetch = 0 : i64, scratch_operands = 1 : i64, tpu.core_type = #tpu.core_type<tc>, window_params = [{transform_indices = @transform_0, window_bounds = array<i64: 8, 16, 16>}, {transform_indices = @transform_1, window_bounds = array<i64: 8, 16, 16>}]} {
    %c0 = arith.constant 0 : index
    %c0_0 = arith.constant 0 : index
    %c0_1 = arith.constant 0 : index
    %0 = vector.load %arg1[%c0, %c0_0, %c0_1] : memref<8x16x16xf32, #tpu.memory_space<vmem>>, vector<8x16x16xf32>
    %cst = arith.constant 0.000000e+00 : f32
    %1 = vector.broadcast %cst : f32 to vector<8x1x18xf32>
    %c0_2 = arith.constant 0 : index
    %c0_3 = arith.constant 0 : index
    %c0_4 = arith.constant 0 : index
    %2 = vector.load %arg3[%c0_2, %c0_3, %c0_4] : memref<8x18x18xf32, #tpu.memory_space<vmem>>, vector<8x1x18xf32>
    tpu.vector_store %arg3[%c0_2, %c0_3, %c0_4], %1 {strides = array<i32>} : memref<8x18x18xf32, #tpu.memory_space<vmem>>, vector<8x1x18xf32>,
    %c0_5 = arith.constant 0 : index
    %c17 = arith.constant 17 : index
    %c0_6 = arith.constant 0 : index
    %3 = vector.load %arg3[%c0_5, %c17, %c0_6] : memref<8x18x18xf32, #tpu.memory_space<vmem>>, vector<8x1x18xf32>
    tpu.vector_store %arg3[%c0_5, %c17, %c0_6], %1 {strides = array<i32>} : memref<8x18x18xf32, #tpu.memory_space<vmem>>, vector<8x1x18xf32>,
    %c0_7 = arith.constant 0 : index
    %c1 = arith.constant 1 : index
    %c1_8 = arith.constant 1 : index
    %4 = vector.load %arg3[%c0_7, %c1, %c1_8] : memref<8x18x18xf32, #tpu.memory_space<vmem>>, vector<8x16x16xf32>
    tpu.vector_store %arg3[%c0_7, %c1, %c1_8], %0 {strides = array<i32>} : memref<8x18x18xf32, #tpu.memory_space<vmem>>, vector<8x16x16xf32>,
    %5 = tpu.iota {dimensions = array<i32: 2>} : vector<1x1x16xi32>
    %c0_i32 = arith.constant 0 : i32
    %6 = vector.broadcast %c0_i32 : i32 to vector<1x1x16xi32>
    %7 = arith.cmpi sgt, %5, %6 : vector<1x1x16xi32>
    %c0_9 = arith.constant 0 : index
    %c0_10 = arith.constant 0 : index
    %c0_11 = arith.constant 0 : index
    %8 = vector.load %arg3[%c0_9, %c0_10, %c0_11] : memref<8x18x18xf32, #tpu.memory_space<vmem>>, vector<8x18x16xf32>
    %cst_12 = arith.constant 0.000000e+00 : f32
    %9 = vector.shape_cast %7 : vector<1x1x16xi1> to vector<1x1x16xi1>
    %10 = vector.broadcast %9 : vector<1x1x16xi1> to vector<8x18x16xi1>
    %11 = vector.broadcast %cst_12 : f32 to vector<8x18x16xf32>
    %12 = arith.select %10, %8, %11 : vector<8x18x16xi1>, vector<8x18x16xf32>
    %c0_13 = arith.constant 0 : index
    %c0_14 = arith.constant 0 : index
    %c1_15 = arith.constant 1 : index
    %13 = vector.load %arg3[%c0_13, %c0_14, %c1_15] : memref<8x18x18xf32, #tpu.memory_space<vmem>>, vector<8x18x16xf32>
    %c15_i32 = arith.constant 15 : i32
    %14 = vector.broadcast %c15_i32 : i32 to vector<1x1x16xi32>
    %15 = arith.cmpi slt, %5, %14 : vector<1x1x16xi32>
    %c0_16 = arith.constant 0 : index
    %c0_17 = arith.constant 0 : index
    %c2 = arith.constant 2 : index
    %16 = vector.load %arg3[%c0_16, %c0_17, %c2] : memref<8x18x18xf32, #tpu.memory_space<vmem>>, vector<8x18x16xf32>
    %cst_18 = arith.constant 0.000000e+00 : f32
    %17 = vector.shape_cast %15 : vector<1x1x16xi1> to vector<1x1x16xi1>
    %18 = vector.broadcast %17 : vector<1x1x16xi1> to vector<8x18x16xi1>
    %19 = vector.broadcast %cst_18 : f32 to vector<8x18x16xf32>
    %20 = arith.select %18, %16, %19 : vector<8x18x16xi1>, vector<8x18x16xf32>
    %cst_19 = arith.constant 2.000000e+00 : f32
    %21 = vector.broadcast %cst_19 : f32 to vector<8x18x16xf32>
    %22 = arith.mulf %21, %13 : vector<8x18x16xf32>
    %23 = arith.addf %12, %22 : vector<8x18x16xf32>
    %24 = arith.addf %23, %20 : vector<8x18x16xf32>
    %25 = arith.subf %20, %12 : vector<8x18x16xf32>
    %26 = vector.extract_strided_slice %25 {offsets = [0, 0, 0], sizes = [8, 16, 16], strides = [1, 1, 1]} : vector<8x18x16xf32> to vector<8x16x16xf32>
    %27 = vector.extract_strided_slice %25 {offsets = [0, 1, 0], sizes = [8, 16, 16], strides = [1, 1, 1]} : vector<8x18x16xf32> to vector<8x16x16xf32>
    %cst_20 = arith.constant 2.000000e+00 : f32
    %28 = vector.broadcast %cst_20 : f32 to vector<8x16x16xf32>
    %29 = arith.mulf %28, %27 : vector<8x16x16xf32>
    %30 = arith.addf %26, %29 : vector<8x16x16xf32>
    %31 = vector.extract_strided_slice %25 {offsets = [0, 2, 0], sizes = [8, 16, 16], strides = [1, 1, 1]} : vector<8x18x16xf32> to vector<8x16x16xf32>
    %32 = arith.addf %30, %31 : vector<8x16x16xf32>
    %33 = vector.extract_strided_slice %24 {offsets = [0, 0, 0], sizes = [8, 16, 16], strides = [1, 1, 1]} : vector<8x18x16xf32> to vector<8x16x16xf32>
    %34 = vector.extract_strided_slice %24 {offsets = [0, 2, 0], sizes = [8, 16, 16], strides = [1, 1, 1]} : vector<8x18x16xf32> to vector<8x16x16xf32>
    %35 = arith.subf %33, %34 : vector<8x16x16xf32>
    %cst_21 = arith.constant 1.000000e-03 : f32
    %36 = vector.broadcast %cst_21 : f32 to vector<8x16x16xf32>
    %37 = arith.addf %0, %36 : vector<8x16x16xf32>
    %38 = tpu.reciprocal %37 {approx = true} : vector<8x16x16xf32> -> vector<8x16x16xf32>
    %39 = arith.mulf %32, %38 : vector<8x16x16xf32>
    %40 = arith.mulf %35, %38 : vector<8x16x16xf32>
    %41 = arith.mulf %39, %39 : vector<8x16x16xf32>
    %42 = arith.mulf %40, %40 : vector<8x16x16xf32>
    %43 = arith.addf %41, %42 : vector<8x16x16xf32>
    %cst_22 = arith.constant 1.000000e-30 : f32
    %44 = vector.broadcast %cst_22 : f32 to vector<8x16x16xf32>
    %45 = arith.addf %43, %44 : vector<8x16x16xf32>
    %46 = math.rsqrt %45 : vector<8x16x16xf32>
    %47 = arith.mulf %43, %46 : vector<8x16x16xf32>
    %cst_23 = arith.constant 1.000000e+00 : f32
    %48 = vector.broadcast %cst_23 : f32 to vector<8x16x16xf32>
    %49 = arith.cmpf ogt, %43, %48 : vector<8x16x16xf32>
    %50 = arith.select %49, %46, %47 : vector<8x16x16xi1>, vector<8x16x16xf32>
    %51 = arith.mulf %50, %50 : vector<8x16x16xf32>
    %cst_24 = arith.constant -1.172120e-02 : f32
    %52 = vector.broadcast %cst_24 : f32 to vector<8x16x16xf32>
    %53 = arith.mulf %52, %51 : vector<8x16x16xf32>
    %cst_25 = arith.constant 0.0526533201 : f32
    %54 = vector.broadcast %cst_25 : f32 to vector<8x16x16xf32>
    %55 = arith.addf %53, %54 : vector<8x16x16xf32>
    %56 = arith.mulf %55, %51 : vector<8x16x16xf32>
    %cst_26 = arith.constant -0.116432868 : f32
    %57 = vector.broadcast %cst_26 : f32 to vector<8x16x16xf32>
    %58 = arith.addf %56, %57 : vector<8x16x16xf32>
    %59 = arith.mulf %58, %51 : vector<8x16x16xf32>
    %cst_27 = arith.constant 0.193543464 : f32
    %60 = vector.broadcast %cst_27 : f32 to vector<8x16x16xf32>
    %61 = arith.addf %59, %60 : vector<8x16x16xf32>
    %62 = arith.mulf %61, %51 : vector<8x16x16xf32>
    %cst_28 = arith.constant -0.332623482 : f32
    %63 = vector.broadcast %cst_28 : f32 to vector<8x16x16xf32>
    %64 = arith.addf %62, %63 : vector<8x16x16xf32>
    %65 = arith.mulf %64, %51 : vector<8x16x16xf32>
    %cst_29 = arith.constant 0.999977231 : f32
    %66 = vector.broadcast %cst_29 : f32 to vector<8x16x16xf32>
    %67 = arith.addf %65, %66 : vector<8x16x16xf32>
    %68 = arith.mulf %50, %67 : vector<8x16x16xf32>
    %cst_30 = arith.constant 1.57079637 : f32
    %69 = vector.broadcast %cst_30 : f32 to vector<8x16x16xf32>
    %70 = arith.subf %69, %68 : vector<8x16x16xf32>
    %71 = arith.select %49, %70, %68 : vector<8x16x16xi1>, vector<8x16x16xf32>
    %c0_31 = arith.constant 0 : index
    %c0_32 = arith.constant 0 : index
    %c0_33 = arith.constant 0 : index
    %72 = vector.load %arg2[%c0_31, %c0_32, %c0_33] : memref<8x16x16xf32, #tpu.memory_space<vmem>>, vector<8x16x16xf32>
    tpu.vector_store %arg2[%c0_31, %c0_32, %c0_33], %71 {strides = array<i32>} : memref<8x16x16xf32, #tpu.memory_space<vmem>>, vector<8x16x16xf32>,
    return
  }
  func.func @transform_0(%arg0: i32) -> (i32, i32, i32) {
    %c0_i32 = arith.constant 0 : i32
    %c0_i32_0 = arith.constant 0 : i32
    %c0_i32_1 = arith.constant 0 : i32
    return %arg0, %c0_i32, %c0_i32_0 : i32, i32, i32
  }
  func.func @transform_1(%arg0: i32) -> (i32, i32, i32) {
    %c0_i32 = arith.constant 0 : i32
    %c0_i32_0 = arith.constant 0 : i32
    %c0_i32_1 = arith.constant 0 : i32
    return %arg0, %c0_i32, %c0_i32_0 : i32, i32, i32
  }
}

</mosaic_0001>

<bundles_post_ra>
// kernel: tpu_custom_call.1
= control target key start
LH: loop header
LB: loop body
LE: loop exit
PB: predicated region body
PF: predicated region fallthrough
CT: control target
= control target key end

     0   :  { %6 = vsyncpa [#allocation4], 0  ;;  %s2509_s0 = inlined_call_operand.hbm [shape: f32[8,16,16], index: 0, kind: input, shape index: {}]   ;;  %s2510_s1 = inlined_call_operand.hbm [shape: f32[8,16,16], index: 1, kind: output, shape index: {}]  }
   0x1   :  { %7 = vsyncpa [#allocation5], 0  ;;  %s1389_s6 = smov [#allocation3]   ;;  %s1341_s10 = scalar_lea.hbm %s2509_s0, 2048 }
   0x2   :  { %s13_s7 = sshll.u32 %s1389_s6, 4  ;;  %p1342_p0 = scmp.ne.s32.totalorder %s2509_s0, %s1341_s10  ;;  %s14_s7 = int_to_ptr.vmem [resolvable:$true] %s13_s7 }
   0x3   :  { %p1345_p1 = scmp.lt.u32.totalorder %s1341_s10, %s2509_s0 }
   0x5   :  { %p1347_p2 = pnand %p1345_p1, %p1342_p0 }
   0x7   :  { %1350 = shalt.err (!%p1347_p2)
}
   0x8   :  { %s1351_s15 = scalar_lea.vmem %s14_s7, 2048  ;;  %p1356_p4 = scmp.lt.s32.totalorder %s14_s7, %s14_s7 }
   0x9   :  { %p1352_p3 = scmp.ne.s32.totalorder %s14_s7, %s1351_s15  ;;  %p1357_p5 = scmp.lt.s32.totalorder %s1351_s15, %s1351_s15 }
   0xb   :  { %p1358_p6 = por %p1357_p5, %p1356_p4 }
   0xd   :  { %p1359_p7 = pnand %p1358_p6, %p1352_p3 }
   0xf   :  { %1362 = shalt.err (!%p1359_p7)
}
  0x10   :  { %s1390_s16 = smov 128   ;;  %s1391_s17 = smov 8  }
  0x11   :  { %19 = dma.hbm_to_vmem [thread:$0]  %s2509_s0, 2048, %s14_s7, [#allocation4], %s1390_s16, %s1390_s16, %s1391_s17  }
  0x12   :  { %1385 = dma.done.wait [#allocation4], 2048  }
  0x13   :  { %1386 = vsyncadd [#allocation4], 4294965248  ;;  %vm39_vm0 = vcmask 139264   ;;  %v1392_v0 = vmov 0.0   ;;  %v1438_v1 = vld [vmem:[#allocation3] sm:$0xff]  ;;  %v1440_v2 = vld [vmem:[#allocation3 + $0x10] sm:$0xff]  ;;  %v137_v36 = vlaneseq }
  0x14   :  { %40 = vst.msk [vmem:[#allocation2] sm:$0x1] %vm39_vm0, %v1392_v0  ;;  %41 = vst.msk [vmem:[#allocation2 + $0x18] sm:$0x1] %vm39_vm0, %v1392_v0  ;;  %s1393_s0 = smov 1   ;;  %v1444_v3 = vld [vmem:[#allocation3 + $0x8] sm:$0xff] }
  0x15   :  { %42 = vst.msk [vmem:[#allocation2 + $0x30] sm:$0x1] %vm39_vm0, %v1392_v0  ;;  %43 = vst.msk [vmem:[#allocation2 + $0x48] sm:$0x1] %vm39_vm0, %v1392_v0  ;;  %72 = vrot.lane.b32.xlu0 %v1438_v1, %s1393_s0  ;;  %76 = vrot.lane.b32.xlu1 %v1440_v2, %s1393_s0  ;;  %v1446_v4 = vld [vmem:[#allocation3 + $0x18] sm:$0xff]  ;;  %v1450_v5 = vld [vmem:[#allocation3 + $0x20] sm:$0xff] }
  0x16   :  { %44 = vst.msk [vmem:[#allocation2 + $0x60] sm:$0x1] %vm39_vm0, %v1392_v0  ;;  %45 = vst.msk [vmem:[#allocation2 + $0x78] sm:$0x1] %vm39_vm0, %v1392_v0  ;;  %v1452_v6 = vld [vmem:[#allocation3 + $0x28] sm:$0xff]  ;;  %v1456_v7 = vld [vmem:[#allocation3 + $0x38] sm:$0xff] }
  0x17   :  { %46 = vst.msk [vmem:[#allocation2 + $0x90] sm:$0x1] %vm39_vm0, %v1392_v0  ;;  %47 = vst.msk [vmem:[#allocation2 + $0xa8] sm:$0x1] %vm39_vm0, %v1392_v0  ;;  %v1458_v8 = vld [vmem:[#allocation3 + $0x30] sm:$0xff]  ;;  %v1462_v9 = vld [vmem:[#allocation3 + $0x40] sm:$0xff] }
  0x18   :  { %48 = vst.msk [vmem:[#allocation2 + $0x11] sm:$0x1] %vm39_vm0, %v1392_v0  ;;  %49 = vst.msk [vmem:[#allocation2 + $0x29] sm:$0x1] %vm39_vm0, %v1392_v0  ;;  %v1464_v10 = vld [vmem:[#allocation3 + $0x48] sm:$0xff]  ;;  %v1468_v11 = vld [vmem:[#allocation3 + $0x58] sm:$0xff] }
  0x19   :  { %50 = vst.msk [vmem:[#allocation2 + $0x41] sm:$0x1] %vm39_vm0, %v1392_v0  ;;  %51 = vst.msk [vmem:[#allocation2 + $0x59] sm:$0x1] %vm39_vm0, %v1392_v0  ;;  %74 = vrot.lane.b32.xlu0 %v1444_v3, %s1393_s0  ;;  %78 = vrot.lane.b32.xlu1 %v1446_v4, %s1393_s0  ;;  %v1470_v12 = vld [vmem:[#allocation3 + $0x50] sm:$0xff]  ;;  %v1474_v13 = vld [vmem:[#allocation3 + $0x60] sm:$0xff] }
  0x1a   :  { %52 = vst.msk [vmem:[#allocation2 + $0x71] sm:$0x1] %vm39_vm0, %v1392_v0  ;;  %53 = vst.msk [vmem:[#allocation2 + $0x89] sm:$0x1] %vm39_vm0, %v1392_v0  ;;  %v1476_v14 = vld [vmem:[#allocation3 + $0x68] sm:$0xff]  ;;  %v1480_v15 = vld [vmem:[#allocation3 + $0x78] sm:$0xff] }
  0x1b   :  { %54 = vst.msk [vmem:[#allocation2 + $0xa1] sm:$0x1] %vm39_vm0, %v1392_v0  ;;  %55 = vst.msk [vmem:[#allocation2 + $0xb9] sm:$0x1] %vm39_vm0, %v1392_v0  ;;  %v1482_v16 = vld [vmem:[#allocation3 + $0x70] sm:$0xff]  ;;  %vm120_vm1 = vcmask 138248  }
  0x1c   :  { %s1394_s20 = smov 126   ;;  %v1536_v41 = vand.u32 127, %v137_v36  ;;  %s1395_s21 = smov 127   ;;  %vm553_vm4 = vcmask 1046528   ;;  %vm650_vm5 = vcmask 1045504   ;;  %vm1235_vm14 = vcmask 130048  }
  0x1d   :  { %80 = vrot.lane.b32.xlu0 %v1450_v5, %s1393_s0  ;;  %82 = vrot.lane.b32.xlu1 %v1452_v6, %s1393_s0  ;;  %s1396_s22 = smov [#allocation6]  }
  0x1e   :  { %vm139_vm2 = vcmp.gt.s32.totalorder %v1536_v41, 0  ;;  %vm190_vm3 = vcmp.lt.s32.totalorder %v1536_v41, 15  ;;  %s1257_s23 = sshll.u32 %s1396_s22, 4  ;;  %s1258_s23 = int_to_ptr.vmem [resolvable:$true] %s1257_s23 }
  0x1f   :  { %s1363_s24 = scalar_lea.vmem %s1258_s23, 2048  ;;  %p1368_p9 = scmp.lt.s32.totalorder %s1258_s23, %s1258_s23 }
  0x20   :  { %p1364_p8 = scmp.ne.s32.totalorder %s1258_s23, %s1363_s24  ;;  %p1369_p10 = scmp.lt.s32.totalorder %s1363_s24, %s1363_s24 }
  0x21   :  { %86 = vrot.lane.b32.xlu1 %v1456_v7, %s1393_s0  ;;  %84 = vrot.lane.b32.xlu0 %v1458_v8, %s1393_s0 }
  0x22   :  { %p1370_p11 = por %p1369_p10, %p1368_p9 }
  0x24   :  { %p1371_p12 = pnand %p1370_p11, %p1364_p8 }
  0x25   :  { %88 = vrot.lane.b32.xlu0 %v1462_v9, %s1393_s0  ;;  %90 = vrot.lane.b32.xlu1 %v1464_v10, %s1393_s0 }
  0x29   :  { %94 = vrot.lane.b32.xlu1 %v1468_v11, %s1393_s0  ;;  %92 = vrot.lane.b32.xlu0 %v1470_v12, %s1393_s0 }
  0x2d   :  { %96 = vrot.lane.b32.xlu0 %v1474_v13, %s1393_s0  ;;  %98 = vrot.lane.b32.xlu1 %v1476_v14, %s1393_s0 }
  0x31   :  { %102 = vrot.lane.b32.xlu1 %v1480_v15, %s1393_s0  ;;  %100 = vrot.lane.b32.xlu0 %v1482_v16, %s1393_s0 }
  0x87   :  { %v73_v17 = vpop.permute.xlu0 %72  ;;  %v77_v18 = vpop.permute.xlu1 %76 }
  0x88   :  { %121 = vst.msk [vmem:[#allocation2 + $0x1] sm:$0xff] %vm120_vm1, %v73_v17  ;;  %123 = vst.msk [vmem:[#allocation2 + $0x19] sm:$0xff] %vm120_vm1, %v77_v18 }
  0x8b   :  { %v75_v19 = vpop.permute.xlu0 %74  ;;  %v79_v20 = vpop.permute.xlu1 %78 }
  0x8c   :  { %122 = vst.msk [vmem:[#allocation2 + $0x9] sm:$0xff] %vm120_vm1, %v75_v19  ;;  %124 = vst.msk [vmem:[#allocation2 + $0x21] sm:$0xff] %vm120_vm1, %v79_v20 }
  0x8f   :  { %v1490_v21 = vld [vmem:[#allocation2] sm:$0xff]  ;;  %v81_v22 = vpop.permute.xlu0 %80  ;;  %v83_v23 = vpop.permute.xlu1 %82  ;;  %v1508_v29 = vld [vmem:[#allocation2 + $0x18] sm:$0xff] }
  0x90   :  { %217 = vrot.lane.b32.xlu0 %v1490_v21, %s1394_s20  ;;  %125 = vst.msk [vmem:[#allocation2 + $0x31] sm:$0xff] %vm120_vm1, %v81_v22  ;;  %126 = vst.msk [vmem:[#allocation2 + $0x39] sm:$0xff] %vm120_vm1, %v83_v23  ;;  %v313_v18 = vmul.f32 2.0, %v1490_v21  ;;  %v316_v23 = vmul.f32 2.0, %v1508_v29 }
  0x93   :  { %v1496_v24 = vld [vmem:[#allocation2 + $0x10] sm:$0x3]  ;;  %v1498_v25 = vld [vmem:[#allocation2 + $0x8] sm:$0xff]  ;;  %v87_v26 = vpop.permute.xlu1 %86  ;;  %v85_v27 = vpop.permute.xlu0 %84  ;;  %v1506_v28 = vld [vmem:[#allocation2 + $0x20] sm:$0xff] }
  0x94   :  { %221 = vrot.lane.b32.xlu0 %v1496_v24, %s1394_s20  ;;  %219 = vrot.lane.b32.xlu1 %v1498_v25, %s1394_s20  ;;  %128 = vst.msk [vmem:[#allocation2 + $0x51] sm:$0xff] %vm120_vm1, %v87_v26  ;;  %127 = vst.msk [vmem:[#allocation2 + $0x49] sm:$0xff] %vm120_vm1, %v85_v27  ;;  %v1516_v32 = vld [vmem:[#allocation2 + $0x28] sm:$0x3]  ;;  %v315_v19 = vmul.f32 2.0, %v1496_v24  ;;  %v314_v20 = vmul.f32 2.0, %v1498_v25 }
  0x95   :  { %v317_v22 = vmul.f32 2.0, %v1506_v28  ;;  %v318_v27 = vmul.f32 2.0, %v1516_v32 }
  0x97   :  { %v89_v30 = vpop.permute.xlu0 %88  ;;  %v91_v31 = vpop.permute.xlu1 %90  ;;  %v1518_v33 = vld [vmem:[#allocation2 + $0x30] sm:$0xff]  ;;  %v1526_v37 = vld [vmem:[#allocation2 + $0x38] sm:$0xff]  ;;  %v1528_v38 = vld [vmem:[#allocation2 + $0x40] sm:$0x3] }
  0x98   :  { %225 = vrot.lane.b32.xlu0 %v1506_v28, %s1394_s20  ;;  %223 = vrot.lane.b32.xlu1 %v1508_v29, %s1394_s20  ;;  %129 = vst.msk [vmem:[#allocation2 + $0x61] sm:$0xff] %vm120_vm1, %v89_v30  ;;  %130 = vst.msk [vmem:[#allocation2 + $0x69] sm:$0xff] %vm120_vm1, %v91_v31  ;;  %v319_v26 = vmul.f32 2.0, %v1518_v33  ;;  %v321_v30 = vmul.f32 2.0, %v1528_v38  ;;  %v320_v31 = vmul.f32 2.0, %v1526_v37 }
  0x9b   :  { %v95_v34 = vpop.permute.xlu1 %94  ;;  %v93_v35 = vpop.permute.xlu0 %92  ;;  %v1538_v42 = vld [vmem:[#allocation2 + $0x50] sm:$0xff]  ;;  %v1540_v43 = vld [vmem:[#allocation2 + $0x48] sm:$0xff]  ;;  %v1551_v47 = vld [vmem:[#allocation2 + $0x58] sm:$0x3] }
  0x9c   :  { %227 = vrot.lane.b32.xlu1 %v1516_v32, %s1394_s20  ;;  %229 = vrot.lane.b32.xlu0 %v1518_v33, %s1394_s20  ;;  %132 = vst.msk [vmem:[#allocation2 + $0x81] sm:$0xff] %vm120_vm1, %v95_v34  ;;  %131 = vst.msk [vmem:[#allocation2 + $0x79] sm:$0xff] %vm120_vm1, %v93_v35  ;;  %v323_v34 = vmul.f32 2.0, %v1538_v42  ;;  %v322_v35 = vmul.f32 2.0, %v1540_v43 }
  0x9f   :  { %v97_v39 = vpop.permute.xlu0 %96  ;;  %v99_v40 = vpop.permute.xlu1 %98  ;;  %v1553_v48 = vld [vmem:[#allocation2 + $0x60] sm:$0xff]  ;;  %v1575_v54 = vld [vmem:[#allocation2 + $0x68] sm:$0xff]  ;;  %v1577_v55 = vld [vmem:[#allocation2 + $0x70] sm:$0x3] }
  0xa0   :  { %231 = vrot.lane.b32.xlu1 %v1526_v37, %s1394_s20  ;;  %233 = vrot.lane.b32.xlu0 %v1528_v38, %s1394_s20  ;;  %133 = vst.msk [vmem:[#allocation2 + $0x91] sm:$0xff] %vm120_vm1, %v97_v39  ;;  %134 = vst.msk [vmem:[#allocation2 + $0x99] sm:$0xff] %vm120_vm1, %v99_v40  ;;  %v325_v36 = vmul.f32 2.0, %v1553_v48  ;;  %v324_v39 = vmul.f32 2.0, %v1551_v47  ;;  %v327_v40 = vmul.f32 2.0, %v1577_v55 }
  0xa3   :  { %v103_v44 = vpop.permute.xlu1 %102  ;;  %v101_v45 = vpop.permute.xlu0 %100  ;;  %v1542_v46 = vld [vmem:[#allocation2 + $0x88] sm:$0x3]  ;;  %v1599_v62 = vld [vmem:[#allocation2 + $0x80] sm:$0xff]  ;;  %v1601_v63 = vld [vmem:[#allocation2 + $0x78] sm:$0xff] }
  0xa4   :  { %237 = vrot.lane.b32.xlu0 %v1538_v42, %s1394_s20  ;;  %235 = vrot.lane.b32.xlu1 %v1540_v43, %s1394_s20  ;;  %136 = vst.msk [vmem:[#allocation2 + $0xb1] sm:$0xff] %vm120_vm1, %v103_v44  ;;  %135 = vst.msk [vmem:[#allocation2 + $0xa9] sm:$0xff] %vm120_vm1, %v101_v45  ;;  %v1558_v49 = vsel %vm139_vm2, %v1542_v46, 0.0  ;;  %v326_v44 = vmul.f32 2.0, %v1575_v54  ;;  %v329_v45 = vmul.f32 2.0, %v1599_v62 }
  0xa5   :  { %2549 = vst [vmem:[#allocation9_spill] sm:$0xff] %v1558_v49 }
  0xa7   :  { %v1560_v50 = vld [vmem:[#allocation2 + $0x90] sm:$0xff]  ;;  %v1562_v51 = vld [vmem:[#allocation2 + $0x98] sm:$0xff]  ;;  %v1564_v52 = vld [vmem:[#allocation2 + $0xa0] sm:$0x3] }
  0xa8   :  { %239 = vrot.lane.b32.xlu1 %v1551_v47, %s1394_s20  ;;  %241 = vrot.lane.b32.xlu0 %v1553_v48, %s1394_s20  ;;  %v1573_v53 = vsel %vm139_vm2, %v1560_v50, 0.0  ;;  %v1582_v56 = vsel %vm139_vm2, %v1562_v51, 0.0  ;;  %v1587_v57 = vsel %vm139_vm2, %v1564_v52, 0.0 }
  0xa9   :  { %2550 = vst [vmem:[#allocation10_spill] sm:$0xff] %v1573_v53  ;;  %2551 = vst [vmem:[#allocation11_spill] sm:$0xff] %v1582_v56 }
  0xaa   :  { %2552 = vst [vmem:[#allocation12_spill] sm:$0xff] %v1587_v57 }
  0xab   :  { %v162_v58 = vld [vmem:[#allocation2 + $0xb0] sm:$0xff]  ;;  %v161_v59 = vld [vmem:[#allocation2 + $0xa8] sm:$0xff]  ;;  %v1589_v60 = vld [vmem:[#allocation2 + $0xb8] sm:$0x3] }
  0xac   :  { %243 = vrot.lane.b32.xlu1 %v1575_v54, %s1394_s20  ;;  %245 = vrot.lane.b32.xlu0 %v1577_v55, %s1394_s20  ;;  %v1597_v61 = vsel %vm139_vm2, %v161_v59, 0.0  ;;  %v1605_v0 = vsel %vm139_vm2, %v162_v58, 0.0  ;;  %v1610_v17 = vsel %vm139_vm2, %v1589_v60, 0.0 }
  0xad   :  { %2553 = vst [vmem:[#allocation13_spill] sm:$0xff] %v1605_v0 }
  0xb0   :  { %249 = vrot.lane.b32.xlu0 %v1599_v62, %s1394_s20  ;;  %247 = vrot.lane.b32.xlu1 %v1601_v63, %s1394_s20 }
  0xb4   :  { %251 = vrot.lane.b32.xlu1 %v1542_v46, %s1394_s20  ;;  %253 = vrot.lane.b32.xlu0 %v1560_v50, %s1394_s20 }
  0xb8   :  { %255 = vrot.lane.b32.xlu1 %v1562_v51, %s1394_s20  ;;  %257 = vrot.lane.b32.xlu0 %v1564_v52, %s1394_s20 }
  0xbc   :  { %261 = vrot.lane.b32.xlu0 %v162_v58, %s1394_s20  ;;  %259 = vrot.lane.b32.xlu1 %v161_v59, %s1394_s20 }
  0xc0   :  { %361 = vrot.lane.b32.xlu0 %v313_v18, %s1395_s21  ;;  %263 = vrot.lane.b32.xlu1 %v1589_v60, %s1394_s20  ;;  %v328_v18 = vmul.f32 2.0, %v1601_v63 }
  0xc4   :  { %365 = vrot.lane.b32.xlu0 %v315_v19, %s1395_s21  ;;  %363 = vrot.lane.b32.xlu1 %v314_v20, %s1395_s21  ;;  %v331_v19 = vmul.f32 2.0, %v1560_v50  ;;  %v330_v20 = vmul.f32 2.0, %v1542_v46  ;;  %v336_v46 = vmul.f32 2.0, %v1589_v60  ;;  %v819_v50 = vadd.f32 0.001, %v1438_v1 }
  0xc5   :  { %v825_v60 = vadd.f32 0.001, %v1458_v8  ;;  %v827_v1 = vadd.f32 0.001, %v1462_v9 }
  0xc6   :  { %1277 = vrcp.f32 %v819_v50 }
  0xc8   :  { %369 = vrot.lane.b32.xlu0 %v317_v22, %s1395_s21  ;;  %367 = vrot.lane.b32.xlu1 %v316_v23, %s1395_s21  ;;  %v333_v22 = vmul.f32 2.0, %v1564_v52  ;;  %v332_v23 = vmul.f32 2.0, %v1562_v51  ;;  %v821_v52 = vadd.f32 0.001, %v1440_v2  ;;  %v820_v51 = vadd.f32 0.001, %v1444_v3 }
  0xc9   :  { %v828_v2 = vadd.f32 0.001, %v1464_v10  ;;  %v830_v3 = vadd.f32 0.001, %v1468_v11  ;;  %v832_v10 = vadd.f32 0.001, %v1476_v14 }
  0xca   :  { %1279 = vrcp.f32 %v821_v52  ;;  %v1715_v14 = vsel %vm139_vm2, %v1498_v25, 0.0 }
  0xcb   :  { %1281 = vrcp.f32 %v820_v51 }
  0xcc   :  { %373 = vrot.lane.b32.xlu0 %v319_v26, %s1395_s21  ;;  %371 = vrot.lane.b32.xlu1 %v318_v27, %s1395_s21  ;;  %v335_v26 = vmul.f32 2.0, %v162_v58  ;;  %v334_v27 = vmul.f32 2.0, %v161_v59  ;;  %v823_v58 = vadd.f32 0.001, %v1450_v5  ;;  %v824_v59 = vadd.f32 0.001, %v1452_v6 }
  0xcd   :  { %v831_v5 = vadd.f32 0.001, %v1474_v13 }
  0xd0   :  { %377 = vrot.lane.b32.xlu0 %v321_v30, %s1395_s21  ;;  %375 = vrot.lane.b32.xlu1 %v320_v31, %s1395_s21  ;;  %v822_v30 = vadd.f32 0.001, %v1446_v4  ;;  %v826_v31 = vadd.f32 0.001, %v1456_v7  ;;  %v829_v4 = vadd.f32 0.001, %v1470_v12  ;;  %v1697_v9 = vpop.eup %1277 }
  0xd1   :  { %v1691_v7 = vsel %vm139_vm2, %v1490_v21, 0.0  ;;  %2554 = vst [vmem:[#allocation14_spill] sm:$0xff] %v1697_v9  ;;  %v1707_v21 = vadd.f32 0.001, %v1480_v15  ;;  %v1726_v15 = vsel %vm139_vm2, %v1496_v24, 0.0  ;;  %v1743_v24 = vsel %vm139_vm2, %v1508_v29, 0.0 }
  0xd2   :  { %1283 = vrcp.f32 %v822_v30  ;;  %2559 = vst [vmem:[#allocation19_spill] sm:$0xff] %v1743_v24 }
  0xd3   :  { %1285 = vrcp.f32 %v823_v58 }
  0xd4   :  { %381 = vrot.lane.b32.xlu0 %v323_v34, %s1395_s21  ;;  %379 = vrot.lane.b32.xlu1 %v322_v35, %s1395_s21  ;;  %1287 = vrcp.f32 %v824_v59  ;;  %v1702_v12 = vpop.eup %1279  ;;  %v1710_v34 = vadd.f32 0.001, %v1482_v16 }
  0xd5   :  { %1289 = vrcp.f32 %v826_v31  ;;  %2555 = vst [vmem:[#allocation15_spill] sm:$0xff] %v1702_v12  ;;  %v1704_v13 = vpop.eup %1281 }
  0xd6   :  { %1291 = vrcp.f32 %v825_v60  ;;  %2556 = vst [vmem:[#allocation16_spill] sm:$0xff] %v1704_v13 }
  0xd7   :  { %1293 = vrcp.f32 %v827_v1 }
  0xd8   :  { %385 = vrot.lane.b32.xlu0 %v325_v36, %s1395_s21  ;;  %383 = vrot.lane.b32.xlu1 %v324_v39, %s1395_s21  ;;  %1295 = vrcp.f32 %v828_v2 }
  0xd9   :  { %1297 = vrcp.f32 %v830_v3 }
  0xda   :  { %1299 = vrcp.f32 %v829_v4 }
  0xdb   :  { %1301 = vrcp.f32 %v831_v5 }
  0xdc   :  { %389 = vrot.lane.b32.xlu0 %v327_v40, %s1395_s21  ;;  %387 = vrot.lane.b32.xlu1 %v326_v44, %s1395_s21  ;;  %v1717_v39 = vpop.eup %1283  ;;  %1303 = vrcp.f32 %v832_v10  ;;  %v1785_v10 = vsel %vm139_vm2, %v1526_v37, 0.0 }
  0xdd   :  { %2557 = vst [vmem:[#allocation17_spill] sm:$0xff] %v1717_v39  ;;  %2564 = vst [vmem:[#allocation24_spill] sm:$0xff] %v1785_v10  ;;  %1305 = vrcp.f32 %v1707_v21 }
  0xde   :  { %1307 = vrcp.f32 %v1710_v34 }
  0xe0   :  { %393 = vrot.lane.b32.xlu0 %v329_v45, %s1395_s21  ;;  %391 = vrot.lane.b32.xlu1 %v328_v18, %s1395_s21  ;;  %v1732_v45 = vpop.eup %1285 }
  0xe4   :  { %397 = vrot.lane.b32.xlu0 %v331_v19, %s1395_s21  ;;  %395 = vrot.lane.b32.xlu1 %v330_v20, %s1395_s21  ;;  %v1738_v19 = vpop.eup %1287 }
  0xe5   :  { %2558 = vst [vmem:[#allocation18_spill] sm:$0xff] %v1738_v19 }
  0xe8   :  { %401 = vrot.lane.b32.xlu0 %v333_v22, %s1395_s21  ;;  %399 = vrot.lane.b32.xlu1 %v332_v23, %s1395_s21  ;;  %v1748_v22 = vsel %vm139_vm2, %v1506_v28, 0.0  ;;  %v1750_v23 = vpop.eup %1289  ;;  %v1765_v28 = vsel %vm139_vm2, %v1516_v32, 0.0  ;;  %v1780_v32 = vsel %vm139_vm2, %v1518_v33, 0.0  ;;  %v1799_v33 = vsel %vm139_vm2, %v1540_v43, 0.0 }
  0xe9   :  { %2560 = vst [vmem:[#allocation20_spill] sm:$0xff] %v1748_v22  ;;  %v1752_v30 = vpop.eup %1291  ;;  %2563 = vst [vmem:[#allocation23_spill] sm:$0xff] %v1780_v32 }
  0xea   :  { %v1767_v31 = vpop.eup %1293 }
  0xeb   :  { %v1771_v4 = vpop.eup %1295 }
  0xec   :  { %405 = vrot.lane.b32.xlu0 %v335_v26, %s1395_s21  ;;  %403 = vrot.lane.b32.xlu1 %v334_v27, %s1395_s21 }
  0xf0   :  { %407 = vrot.lane.b32.xlu1 %v336_v46, %s1395_s21 }
 0x102   :  { %v218_v6 = vpop.permute.xlu0 %217 }
 0x103   :  { %v1695_v8 = vsel %vm190_vm3, %v218_v6, 0.0 }
 0x104   :  { %v481_v11 = vsub.f32 %v1695_v8, %v1691_v7 }
 0x106   :  { %v220_v35 = vpop.permute.xlu1 %219  ;;  %v222_v36 = vpop.permute.xlu0 %221  ;;  %v505_v40 = vmul.f32 2.0, %v481_v11  ;;  %v651_v20 = vrot.slane %v481_v11, 2 }
 0x107   :  { %v1721_v44 = vsel %vm190_vm3, %v220_v35, 0.0  ;;  %v1730_v16 = vsel %vm190_vm3, %v222_v36, 0.0  ;;  %v1787_v35 = vpop.eup %1297 }
 0x108   :  { %v482_v25 = vsub.f32 %v1721_v44, %v1715_v14  ;;  %v483_v18 = vsub.f32 %v1730_v16, %v1726_v15  ;;  %v554_v58 = vrot.slane %v505_v40, 1  ;;  %v1801_v37 = vpop.eup %1299 }
 0x109   :  { %2566 = vst [vmem:[#allocation26_spill] sm:$0xff] %v1801_v37 }
 0x10a   :  { %v506_v26 = vmul.f32 2.0, %v482_v25  ;;  %v652_v27 = vrot.slane %v482_v25, 2  ;;  %v507_v46 = vmul.f32 2.0, %v483_v18  ;;  %v654_v50 = vrot.slane %v483_v18, 2  ;;  %v224_v52 = vpop.permute.xlu1 %223  ;;  %v226_v51 = vpop.permute.xlu0 %225 }
 0x10b   :  { %v1756_v29 = vsel %vm190_vm3, %v224_v52, 0.0  ;;  %v1760_v59 = vsel %vm190_vm3, %v226_v51, 0.0  ;;  %v1803_v51 = vpop.eup %1301 }
 0x10c   :  { %2561 = vst [vmem:[#allocation21_spill] sm:$0xff] %v1756_v29  ;;  %2562 = vst [vmem:[#allocation22_spill] sm:$0xff] %v1760_v59  ;;  %v555_v60 = vrot.slane %v506_v26, 1  ;;  %v653_v1 = vsel %vm650_vm5, %v651_v20, %v652_v27  ;;  %v557_v2 = vrot.slane %v507_v46, 1  ;;  %v655_v3 = vsel %vm650_vm5, %v652_v27, %v654_v50 }
 0x10d   :  { %v484_v5 = vsub.f32 %v1756_v29, %v1743_v24  ;;  %v485_v6 = vsub.f32 %v1760_v59, %v1748_v22  ;;  %v1794_v26 = vsel %vm139_vm2, %v1528_v38, 0.0 }
 0x10e   :  { %v556_v36 = vsel %vm553_vm4, %v554_v58, %v555_v60  ;;  %v558_v40 = vsel %vm553_vm4, %v555_v60, %v557_v2  ;;  %v228_v18 = vpop.permute.xlu1 %227  ;;  %v230_v20 = vpop.permute.xlu0 %229  ;;  %2565 = vst [vmem:[#allocation25_spill] sm:$0xff] %v1794_v26 }
 0x10f   :  { %v610_v27 = vadd.f32 %v556_v36, %v481_v11  ;;  %v611_v46 = vadd.f32 %v558_v40, %v482_v25  ;;  %v508_v50 = vmul.f32 2.0, %v484_v5  ;;  %v656_v52 = vrot.slane %v484_v5, 2  ;;  %v1815_v25 = vpop.eup %1303 }
 0x110   :  { %v509_v58 = vmul.f32 2.0, %v485_v6  ;;  %v657_v60 = vrot.slane %v485_v6, 2  ;;  %v1807_v2 = vsel %vm190_vm3, %v228_v18, 0.0  ;;  %v1811_v38 = vsel %vm190_vm3, %v230_v20, 0.0 }
 0x111   :  { %2567 = vst [vmem:[#allocation27_spill] sm:$0xff] %v1807_v2  ;;  %2568 = vst [vmem:[#allocation28_spill] sm:$0xff] %v1811_v38  ;;  %v707_v43 = vadd.f32 %v653_v1, %v610_v27  ;;  %v708_v59 = vadd.f32 %v655_v3, %v611_v46  ;;  %v559_v29 = vrot.slane %v508_v50, 1  ;;  %v486_v11 = vsub.f32 %v1807_v2, %v1765_v28 }
 0x112   :  { %v560_v36 = vrot.slane %v509_v58, 1  ;;  %v658_v40 = vsel %vm650_vm5, %v656_v52, %v657_v60  ;;  %v487_v22 = vsub.f32 %v1811_v38, %v1780_v32  ;;  %v232_v18 = vpop.permute.xlu1 %231  ;;  %v234_v24 = vpop.permute.xlu0 %233  ;;  %v1823_v20 = vsel %vm139_vm2, %v1538_v42, 0.0 }
 0x113   :  { %v1826_v1 = vmul.f32 %v1697_v9, %v707_v43  ;;  %v1829_v3 = vmul.f32 %v1704_v13, %v708_v59  ;;  %v510_v27 = vmul.f32 2.0, %v486_v11  ;;  %v659_v46 = vrot.slane %v486_v11, 2 }
 0x114   :  { %v561_v50 = vsel %vm553_vm4, %v559_v29, %v560_v36  ;;  %v511_v52 = vmul.f32 2.0, %v487_v22  ;;  %v1834_v58 = vsel %vm190_vm3, %v232_v18, 0.0  ;;  %v1839_v42 = vsel %vm139_vm2, %v1551_v47, 0.0 }
 0x115   :  { %2569 = vst [vmem:[#allocation29_spill] sm:$0xff] %v1834_v58  ;;  %2570 = vst [vmem:[#allocation30_spill] sm:$0xff] %v1839_v42  ;;  %v612_v38 = vadd.f32 %v561_v50, %v484_v5  ;;  %v562_v43 = vrot.slane %v510_v27, 1  ;;  %v661_v9 = vrot.slane %v487_v22, 2  ;;  %v1844_v59 = vsel %vm139_vm2, %v1553_v48, 0.0 }
 0x116   :  { %2571 = vst [vmem:[#allocation31_spill] sm:$0xff] %v1844_v59  ;;  %v660_v29 = vsel %vm650_vm5, %v657_v60, %v659_v46  ;;  %v564_v11 = vrot.slane %v511_v52, 1  ;;  %v488_v18 = vsub.f32 %v1834_v58, %v1785_v10  ;;  %v1851_v13 = vsel %vm190_vm3, %v234_v24, 0.0  ;;  %v236_v47 = vpop.permute.xlu1 %235  ;;  %v238_v32 = vpop.permute.xlu0 %237 }
 0x117   :  { %2572 = vst [vmem:[#allocation32_spill] sm:$0xff] %v1851_v13  ;;  %v709_v5 = vadd.f32 %v658_v40, %v612_v38  ;;  %v563_v27 = vsel %vm553_vm4, %v560_v36, %v562_v43  ;;  %v489_v50 = vsub.f32 %v1851_v13, %v1794_v26  ;;  %v1858_v48 = vsel %vm190_vm3, %v236_v47, 0.0 }
 0x118   :  { %2573 = vst [vmem:[#allocation33_spill] sm:$0xff] %v1858_v48  ;;  %v613_v60 = vadd.f32 %v563_v27, %v485_v6  ;;  %v512_v46 = vmul.f32 2.0, %v488_v18  ;;  %v662_v52 = vrot.slane %v488_v18, 2  ;;  %v490_v58 = vsub.f32 %v1858_v48, %v1799_v33 }
 0x119   :  { %v1863_v24 = vmul.f32 %v1702_v12, %v709_v5  ;;  %v513_v10 = vmul.f32 2.0, %v489_v50  ;;  %v664_v38 = vrot.slane %v489_v50, 2  ;;  %v1867_v36 = vsel %vm190_vm3, %v238_v32, 0.0 }
 0x11a   :  { %v710_v40 = vadd.f32 %v660_v29, %v613_v60  ;;  %v565_v43 = vrot.slane %v512_v46, 1  ;;  %v663_v47 = vsel %vm650_vm5, %v661_v9, %v662_v52  ;;  %v514_v13 = vmul.f32 2.0, %v490_v58  ;;  %v240_v6 = vpop.permute.xlu1 %239  ;;  %v242_v27 = vpop.permute.xlu0 %241 }
 0x11b   :  { %v567_v26 = vrot.slane %v513_v10, 1  ;;  %v665_v2 = vsel %vm650_vm5, %v662_v52, %v664_v38  ;;  %v1874_v5 = vsel %vm139_vm2, %v1575_v54, 0.0  ;;  %v1879_v32 = vsel %vm139_vm2, %v1577_v55, 0.0 }
 0x11c   :  { %2574 = vst [vmem:[#allocation34_spill] sm:$0xff] %v1874_v5  ;;  %v1882_v29 = vmul.f32 %v1717_v39, %v710_v40  ;;  %v566_v9 = vsel %vm553_vm4, %v564_v11, %v565_v43  ;;  %v666_v50 = vrot.slane %v490_v58, 2  ;;  %v491_v10 = vsub.f32 %v1867_v36, %v1823_v20 }
 0x11d   :  { %v614_v60 = vadd.f32 %v566_v9, %v487_v22  ;;  %v568_v46 = vsel %vm553_vm4, %v565_v43, %v567_v26  ;;  %v1890_v54 = vsel %vm190_vm3, %v240_v6, 0.0  ;;  %v1894_v55 = vsel %vm190_vm3, %v242_v27, 0.0 }
 0x11e   :  { %2575 = vst [vmem:[#allocation35_spill] sm:$0xff] %v1890_v54  ;;  %2576 = vst [vmem:[#allocation36_spill] sm:$0xff] %v1894_v55  ;;  %v615_v52 = vadd.f32 %v568_v46, %v488_v18  ;;  %v569_v38 = vrot.slane %v514_v13, 1  ;;  %v515_v40 = vmul.f32 2.0, %v491_v10  ;;  %v667_v48 = vrot.slane %v491_v10, 2  ;;  %v244_v11 = vpop.permute.xlu1 %243  ;;  %v246_v39 = vpop.permute.xlu0 %245 }
 0x11f   :  { %v711_v12 = vadd.f32 %v663_v47, %v614_v60  ;;  %v492_v22 = vsub.f32 %v1890_v54, %v1839_v42  ;;  %v493_v26 = vsub.f32 %v1894_v55, %v1844_v59  ;;  %v1902_v43 = vsel %vm190_vm3, %v244_v11, 0.0 }
 0x120   :  { %2577 = vst [vmem:[#allocation37_spill] sm:$0xff] %v1902_v43  ;;  %v712_v6 = vadd.f32 %v665_v2, %v615_v52  ;;  %v570_v27 = vrot.slane %v515_v40, 1  ;;  %v668_v18 = vsel %vm650_vm5, %v666_v50, %v667_v48  ;;  %v494_v13 = vsub.f32 %v1902_v43, %v1874_v5 }
 0x121   :  { %v1908_v9 = vmul.f32 %v1732_v45, %v711_v12  ;;  %v516_v47 = vmul.f32 2.0, %v492_v22  ;;  %v669_v60 = vrot.slane %v492_v22, 2  ;;  %v517_v46 = vmul.f32 2.0, %v493_v26 }
 0x122   :  { %v1911_v54 = vmul.f32 %v1738_v19, %v712_v6  ;;  %v571_v55 = vsel %vm553_vm4, %v569_v38, %v570_v27  ;;  %v518_v11 = vmul.f32 2.0, %v494_v13  ;;  %v248_v59 = vpop.permute.xlu1 %247  ;;  %v1917_v2 = vsel %vm139_vm2, %v1601_v63, 0.0  ;;  %v250_v50 = vpop.permute.xlu0 %249 }
 0x123   :  { %2578 = vst [vmem:[#allocation38_spill] sm:$0xff] %v1917_v2  ;;  %v616_v52 = vadd.f32 %v571_v55, %v490_v58  ;;  %v572_v40 = vrot.slane %v516_v47, 1  ;;  %v670_v12 = vsel %vm650_vm5, %v667_v48, %v669_v60  ;;  %v1923_v22 = vsel %vm139_vm2, %v1599_v62, 0.0 }
 0x124   :  { %v574_v6 = vrot.slane %v517_v46, 1  ;;  %v671_v43 = vrot.slane %v493_v26, 2  ;;  %v575_v38 = vrot.slane %v518_v11, 1  ;;  %v672_v5 = vrot.slane %v494_v13, 2 }
 0x125   :  { %v713_v19 = vadd.f32 %v668_v18, %v616_v52  ;;  %v573_v42 = vsel %vm553_vm4, %v570_v27, %v572_v40  ;;  %v1928_v63 = vsel %vm190_vm3, %v246_v39, 0.0  ;;  %v1932_v58 = vsel %vm190_vm3, %v248_v59, 0.0 }
 0x126   :  { %2579 = vst [vmem:[#allocation39_spill] sm:$0xff] %v1932_v58  ;;  %v617_v48 = vadd.f32 %v573_v42, %v491_v10  ;;  %v576_v55 = vsel %vm553_vm4, %v574_v6, %v575_v38  ;;  %v673_v62 = vsel %vm650_vm5, %v671_v43, %v672_v5  ;;  %v495_v47 = vsub.f32 %v1928_v63, %v1879_v32  ;;  %v252_v60 = vpop.permute.xlu1 %251  ;;  %v254_v18 = vpop.permute.xlu0 %253 }
 0x127   :  { %v1939_v27 = vmul.f32 %v1752_v30, %v713_v19  ;;  %v618_v46 = vadd.f32 %v576_v55, %v493_v26  ;;  %v496_v39 = vsub.f32 %v1932_v58, %v1917_v2  ;;  %v1945_v59 = vsel %vm190_vm3, %v250_v50, 0.0 }
 0x128   :  { %2580 = vst [vmem:[#allocation40_spill] sm:$0xff] %v1945_v59  ;;  %v714_v42 = vadd.f32 %v670_v12, %v617_v48  ;;  %v519_v10 = vmul.f32 2.0, %v495_v47  ;;  %v674_v11 = vrot.slane %v495_v47, 2  ;;  %v497_v43 = vsub.f32 %v1945_v59, %v1923_v22 }
 0x129   :  { %v715_v52 = vadd.f32 %v673_v62, %v618_v46  ;;  %v520_v40 = vmul.f32 2.0, %v496_v39  ;;  %v676_v19 = vrot.slane %v496_v39, 2  ;;  %v1959_v21 = vsel %vm190_vm3, %v252_v60, 0.0 }
 0x12a   :  { %v1951_v26 = vmul.f32 %v1750_v23, %v714_v42  ;;  %v577_v6 = vrot.slane %v519_v10, 1  ;;  %v675_v55 = vsel %vm650_vm5, %v672_v5, %v674_v11  ;;  %v521_v58 = vmul.f32 2.0, %v497_v43  ;;  %v256_v50 = vpop.permute.xlu1 %255  ;;  %v258_v2 = vpop.permute.xlu0 %257  ;;  %2581 = vst [vmem:[#allocation41_spill] sm:$0xff] %v1959_v21 }
 0x12b   :  { %v1955_v12 = vmul.f32 %v1767_v31, %v715_v52  ;;  %v579_v48 = vrot.slane %v520_v40, 1  ;;  %v677_v47 = vrot.slane %v497_v43, 2  ;;  %v498_v5 = vsub.f32 %v1959_v21, %v1558_v49 }
 0x12c   :  { %v578_v62 = vsel %vm553_vm4, %v575_v38, %v577_v6  ;;  %v580_v46 = vrot.slane %v521_v58, 1  ;;  %v1967_v42 = vmul.f32 %v1826_v1, %v1826_v1  ;;  %v1972_v52 = vsel %vm190_vm3, %v254_v18, 0.0 }
 0x12d   :  { %v619_v10 = vadd.f32 %v578_v62, %v494_v13  ;;  %v678_v11 = vsel %vm650_vm5, %v676_v19, %v677_v47  ;;  %2582 = vst [vmem:[#allocation42_spill] sm:$0xff] %v1972_v52  ;;  %v522_v34 = vmul.f32 2.0, %v498_v5  ;;  %v679_v40 = vrot.slane %v498_v5, 2 }
 0x12e   :  { %v581_v60 = vsel %vm553_vm4, %v579_v48, %v580_v46  ;;  %v499_v38 = vsub.f32 %v1972_v52, %v1573_v53  ;;  %v260_v58 = vpop.permute.xlu1 %259  ;;  %v262_v6 = vpop.permute.xlu0 %261  ;;  %v1979_v1 = vsel %vm190_vm3, %v256_v50, 0.0  ;;  %v1983_v13 = vsel %vm190_vm3, %v258_v2, 0.0 }
 0x12f   :  { %v716_v21 = vadd.f32 %v675_v55, %v619_v10  ;;  %v620_v49 = vadd.f32 %v581_v60, %v496_v39  ;;  %2583 = vst [vmem:[#allocation43_spill] sm:$0xff] %v1979_v1  ;;  %2584 = vst [vmem:[#allocation44_spill] sm:$0xff] %v1983_v13  ;;  %v1987_v18 = vmul.f32 %v1829_v3, %v1829_v3  ;;  %v582_v19 = vrot.slane %v522_v34, 1 }
 0x130   :  { %v680_v48 = vsel %vm650_vm5, %v677_v47, %v679_v40  ;;  %v523_v62 = vmul.f32 2.0, %v499_v38  ;;  %v500_v55 = vsub.f32 %v1979_v1, %v1582_v56  ;;  %v501_v50 = vsub.f32 %v1983_v13, %v1587_v57 }
 0x131   :  { %v1991_v5 = vmul.f32 %v1771_v4, %v716_v21  ;;  %v717_v39 = vadd.f32 %v678_v11, %v620_v49  ;;  %v1999_v2 = vmul.f32 %v1863_v24, %v1863_v24  ;;  %v583_v3 = vsel %vm553_vm4, %v580_v46, %v582_v19  ;;  %v2010_v11 = vpop.eup %1305 }
 0x132   :  { %v2004_v47 = vsel %vm190_vm3, %v260_v58, 0.0  ;;  %v2008_v21 = vsel %vm190_vm3, %v262_v6, 0.0  ;;  %v264_v49 = vpop.permute.xlu1 %263  ;;  %v362_v10 = vpop.permute.xlu0 %361  ;;  %v621_v34 = vadd.f32 %v583_v3, %v497_v43  ;;  %v681_v24 = vrot.slane %v499_v38, 2 }
 0x133   :  { %2585 = vst [vmem:[#allocation45_spill] sm:$0xff] %v2004_v47  ;;  %2586 = vst [vmem:[#allocation46_spill] sm:$0xff] %v2008_v21  ;;  %v2013_v60 = vmul.f32 %v1801_v37, %v717_v39  ;;  %v524_v40 = vmul.f32 2.0, %v500_v55  ;;  %v682_v13 = vrot.slane %v500_v55, 2  ;;  %v525_v46 = vmul.f32 2.0, %v501_v50  ;;  %v2019_v52 = vpop.eup %1307 }
 0x134   :  { %v684_v19 = vrot.slane %v501_v50, 2  ;;  %v502_v58 = vsub.f32 %v2004_v47, %v1597_v61  ;;  %v718_v57 = vadd.f32 %v680_v48, %v621_v34  ;;  %v584_v1 = vrot.slane %v523_v62, 1 }
 0x135   :  { %v585_v6 = vrot.slane %v524_v40, 1  ;;  %v503_v56 = vsub.f32 %v2008_v21, %v1605_v0  ;;  %v683_v39 = vsel %vm650_vm5, %v681_v24, %v682_v13  ;;  %v587_v37 = vrot.slane %v525_v46, 1 }
 0x136   :  { %v685_v43 = vsel %vm650_vm5, %v682_v13, %v684_v19  ;;  %v526_v3 = vmul.f32 2.0, %v502_v58  ;;  %v364_v53 = vpop.permute.xlu1 %363  ;;  %v366_v59 = vpop.permute.xlu0 %365  ;;  %v2024_v50 = vmul.f32 %v1787_v35, %v718_v57  ;;  %v686_v62 = vrot.slane %v502_v58, 2 }
 0x137   :  { %v586_v48 = vsel %vm553_vm4, %v584_v1, %v585_v6  ;;  %v527_v34 = vmul.f32 2.0, %v503_v56  ;;  %v588_v21 = vsel %vm553_vm4, %v585_v6, %v587_v37  ;;  %v687_v47 = vrot.slane %v503_v56, 2 }
 0x138   :  { %v622_v40 = vadd.f32 %v586_v48, %v499_v38  ;;  %v589_v0 = vrot.slane %v526_v3, 1  ;;  %v2030_v24 = vmul.f32 %v1882_v29, %v1882_v29  ;;  %v623_v13 = vadd.f32 %v588_v21, %v500_v55 }
 0x139   :  { %v590_v46 = vrot.slane %v527_v34, 1  ;;  %v2034_v19 = vsel %vm190_vm3, %v264_v49, 0.0  ;;  %v688_v1 = vsel %vm650_vm5, %v686_v62, %v687_v47  ;;  %v433_v37 = vadd.f32 %v362_v10, %v1691_v7 }
 0x13a   :  { %v719_v57 = vadd.f32 %v683_v39, %v622_v40  ;;  %v504_v38 = vsub.f32 %v2034_v19, %v1610_v17  ;;  %v368_v6 = vpop.permute.xlu1 %367  ;;  %v370_v3 = vpop.permute.xlu0 %369  ;;  %v720_v48 = vadd.f32 %v685_v43, %v623_v13  ;;  %v434_v55 = vadd.f32 %v364_v53, %v1715_v14 }
 0x13b   :  { %v591_v29 = vsel %vm553_vm4, %v589_v0, %v590_v46  ;;  %v435_v21 = vadd.f32 %v366_v59, %v1726_v15  ;;  %v457_v7 = vadd.f32 %v433_v37, %v1695_v8  ;;  %v2054_v53 = vmul.f32 %v1908_v9, %v1908_v9  ;;  %v2587_v9 = vld [vmem:[#allocation19_spill] sm:$0xff] }
 0x13c   :  { %v2044_v41 = vmul.f32 %v1803_v51, %v719_v57  ;;  %v624_v49 = vadd.f32 %v591_v29, %v502_v58  ;;  %v528_v39 = vmul.f32 2.0, %v504_v38  ;;  %v689_v62 = vrot.slane %v504_v38, 2 }
 0x13d   :  { %v2047_v34 = vmul.f32 %v1815_v25, %v720_v48  ;;  %v458_v10 = vadd.f32 %v434_v55, %v1721_v44  ;;  %v459_v43 = vadd.f32 %v435_v21, %v1730_v16  ;;  %v2059_v40 = vmul.f32 %v1911_v54, %v1911_v54 }
 0x13e   :  { %v721_v0 = vadd.f32 %v688_v1, %v624_v49  ;;  %v592_v14 = vrot.slane %v528_v39, 1  ;;  %v690_v15 = vsel %vm650_vm5, %v687_v47, %v689_v62  ;;  %v372_v59 = vpop.permute.xlu1 %371  ;;  %v374_v58 = vpop.permute.xlu0 %373  ;;  %v747_v13 = vrot.slane %v457_v7, 2  ;;  %v2588_v1 = vld [vmem:[#allocation20_spill] sm:$0xff]  ;;  %v2589_v39 = vld [vmem:[#allocation21_spill] sm:$0xff] }
 0x13f   :  { %v748_v8 = vrot.slane %v458_v10, 2  ;;  %v750_v57 = vrot.slane %v459_v43, 2  ;;  %v436_v38 = vadd.f32 %v368_v6, %v2587_v9  ;;  %v437_v37 = vadd.f32 %v370_v3, %v2588_v1 }
 0x140   :  { %v2062_v44 = vmul.f32 %v2019_v52, %v721_v0  ;;  %v593_v16 = vsel %vm553_vm4, %v590_v46, %v592_v14  ;;  %v438_v54 = vadd.f32 %v372_v59, %v1765_v28  ;;  %v2072_v55 = vmul.f32 %v1939_v27, %v1939_v27  ;;  %v2590_v0 = vld [vmem:[#allocation22_spill] sm:$0xff]  ;;  %v2594_v28 = vld [vmem:[#allocation16_spill] sm:$0xff] }
 0x141   :  { %v625_v48 = vadd.f32 %v593_v16, %v503_v56  ;;  %v749_v47 = vsel %vm650_vm5, %v747_v13, %v748_v8  ;;  %v751_v29 = vsel %vm650_vm5, %v748_v8, %v750_v57  ;;  %v460_v62 = vadd.f32 %v436_v38, %v2589_v39  ;;  %v2591_v56 = vld [vmem:[#allocation27_spill] sm:$0xff]  ;;  %v2593_v8 = vld [vmem:[#allocation14_spill] sm:$0xff]  ;;  %v2595_v27 = vld [vmem:[#allocation24_spill] sm:$0xff] }
 0x142   :  { %v803_v21 = vsub.f32 %v457_v7, %v749_v47  ;;  %v804_v49 = vsub.f32 %v458_v10, %v751_v29  ;;  %v376_v46 = vpop.permute.xlu1 %375  ;;  %v378_v43 = vpop.permute.xlu0 %377  ;;  %v461_v3 = vadd.f32 %v437_v37, %v2590_v0  ;;  %v462_v14 = vadd.f32 %v438_v54, %v2591_v56  ;;  %v2592_v13 = vld [vmem:[#allocation23_spill] sm:$0xff]  ;;  %v2596_v47 = vld [vmem:[#allocation28_spill] sm:$0xff]  ;;  %v2597_v29 = vld [vmem:[#allocation29_spill] sm:$0xff] }
 0x143   :  { %v722_v6 = vadd.f32 %v690_v15, %v625_v48  ;;  %v439_v16 = vadd.f32 %v374_v58, %v2592_v13  ;;  %v752_v9 = vrot.slane %v460_v62, 2  ;;  %v440_v1 = vadd.f32 %v376_v46, %v2595_v27  ;;  %v2598_v39 = vld [vmem:[#allocation25_spill] sm:$0xff] }
 0x144   :  { %v867_v57 = vmul.f32 %v2593_v8, %v803_v21  ;;  %v868_v59 = vmul.f32 %v2594_v28, %v804_v49  ;;  %v753_v10 = vrot.slane %v461_v3, 2  ;;  %v755_v38 = vrot.slane %v462_v14, 2 }
 0x145   :  { %v2082_v7 = vmul.f32 %v2010_v11, %v722_v6  ;;  %v463_v15 = vadd.f32 %v439_v16, %v2596_v47  ;;  %v464_v54 = vadd.f32 %v440_v1, %v2597_v29  ;;  %v441_v58 = vadd.f32 %v378_v43, %v2598_v39  ;;  %v2600_v1 = vld [vmem:[#allocation15_spill] sm:$0xff] }
 0x146   :  { %v899_v48 = vmul.f32 %v867_v57, %v867_v57  ;;  %v900_v37 = vmul.f32 %v868_v59, %v868_v59  ;;  %v380_v0 = vpop.permute.xlu1 %379  ;;  %v382_v21 = vpop.permute.xlu0 %381  ;;  %v2089_v49 = vmul.f32 %v1951_v26, %v1951_v26  ;;  %v754_v46 = vsel %vm650_vm5, %v752_v9, %v753_v10  ;;  %v2599_v57 = vld [vmem:[#allocation32_spill] sm:$0xff] }
 0x147   :  { %v756_v6 = vsel %vm650_vm5, %v753_v10, %v755_v38  ;;  %v757_v56 = vrot.slane %v463_v15, 2  ;;  %v805_v16 = vsub.f32 %v460_v62, %v754_v46  ;;  %v758_v43 = vrot.slane %v464_v54, 2  ;;  %v2601_v38 = vld [vmem:[#allocation17_spill] sm:$0xff] }
 0x148   :  { %v2094_v14 = vadd.f32 %v899_v48, %v1967_v42  ;;  %v2097_v13 = vadd.f32 %v900_v37, %v1987_v18  ;;  %v806_v8 = vsub.f32 %v461_v3, %v756_v6  ;;  %v465_v28 = vadd.f32 %v441_v58, %v2599_v57  ;;  %v2602_v48 = vld [vmem:[#allocation33_spill] sm:$0xff] }
 0x149   :  { %v442_v59 = vadd.f32 %v380_v0, %v1799_v33  ;;  %v443_v26 = vadd.f32 %v382_v21, %v1823_v20  ;;  %v2104_v9 = vmul.f32 %v1955_v12, %v1955_v12  ;;  %v2108_v42 = vmul.f32 %v1991_v5, %v1991_v5 }
 0x14a   :  { %v931_v18 = vadd.f32 1e-30, %v2094_v14  ;;  %v932_v62 = vadd.f32 1e-30, %v2097_v13  ;;  %v384_v3 = vpop.permute.xlu1 %383  ;;  %v386_v27 = vpop.permute.xlu0 %385  ;;  %v869_v10 = vmul.f32 %v2600_v1, %v805_v16  ;;  %v870_v33 = vmul.f32 %v2601_v38, %v806_v8  ;;  %v2603_v8 = vld [vmem:[#allocation30_spill] sm:$0xff] }
 0x14b   :  { %v759_v20 = vsel %vm650_vm5, %v757_v56, %v758_v43  ;;  %v760_v47 = vrot.slane %v465_v28, 2  ;;  %v466_v37 = vadd.f32 %v442_v59, %v2602_v48  ;;  %v467_v5 = vadd.f32 %v443_v26, %v1867_v36  ;;  %v2604_v36 = vld [vmem:[#allocation31_spill] sm:$0xff]  ;;  %v2605_v26 = vld [vmem:[#allocation18_spill] sm:$0xff] }
 0x14c   :  { %1309 = vrsqrt.f32 %v931_v18  ;;  %v807_v12 = vsub.f32 %v463_v15, %v759_v20  ;;  %v901_v29 = vmul.f32 %v869_v10, %v869_v10  ;;  %v902_v39 = vmul.f32 %v870_v33, %v870_v33  ;;  %v2607_v33 = vld [vmem:[#allocation35_spill] sm:$0xff] }
 0x14d   :  { %1311 = vrsqrt.f32 %v932_v62  ;;  %v761_v58 = vsel %vm650_vm5, %v758_v43, %v760_v47  ;;  %v762_v46 = vrot.slane %v466_v37, 2  ;;  %v763_v6 = vrot.slane %v467_v5, 2  ;;  %v2608_v47 = vld [vmem:[#allocation36_spill] sm:$0xff] }
 0x14e   :  { %v871_v0 = vmul.f32 %v1732_v45, %v807_v12  ;;  %v808_v21 = vsub.f32 %v464_v54, %v761_v58  ;;  %v388_v16 = vpop.permute.xlu1 %387  ;;  %v2120_v56 = vadd.f32 %v901_v29, %v1999_v2  ;;  %v2123_v15 = vadd.f32 %v902_v39, %v2030_v24  ;;  %v2606_v45 = vld [vmem:[#allocation34_spill] sm:$0xff]  ;;  %v390_v62 = vpop.permute.xlu0 %389 }
 0x14f   :  { %v444_v57 = vadd.f32 %v384_v3, %v2603_v8  ;;  %v445_v28 = vadd.f32 %v386_v27, %v2604_v36  ;;  %v764_v43 = vsel %vm650_vm5, %v762_v46, %v763_v6  ;;  %v446_v54 = vadd.f32 %v388_v16, %v2606_v45  ;;  %v2610_v45 = vld [vmem:[#allocation38_spill] sm:$0xff] }
 0x150   :  { %v903_v59 = vmul.f32 %v871_v0, %v871_v0  ;;  %v872_v18 = vmul.f32 %v2605_v26, %v808_v21  ;;  %v2132_v1 = vmul.f32 %v2013_v60, %v2013_v60  ;;  %v2136_v2 = vmul.f32 %v2024_v50, %v2024_v50  ;;  %v2609_v60 = vld [vmem:[#allocation37_spill] sm:$0xff] }
 0x151   :  { %v933_v24 = vadd.f32 1e-30, %v2120_v56  ;;  %v934_v3 = vadd.f32 1e-30, %v2123_v15  ;;  %v809_v38 = vsub.f32 %v466_v37, %v764_v43  ;;  %v468_v20 = vadd.f32 %v444_v57, %v2607_v33 }
 0x152   :  { %v2141_v27 = vadd.f32 %v903_v59, %v2054_v53  ;;  %v904_v10 = vmul.f32 %v872_v18, %v872_v18  ;;  %v469_v12 = vadd.f32 %v445_v28, %v2608_v47  ;;  %v470_v48 = vadd.f32 %v446_v54, %v2609_v60  ;;  %v392_v16 = vpop.permute.xlu1 %391 }
 0x153   :  { %1313 = vrsqrt.f32 %v933_v24  ;;  %v447_v29 = vadd.f32 %v390_v62, %v1879_v32  ;;  %vm979_vm6 = vcmp.gt.f32.partialorder %v2094_v14, 1.0  ;;  %v873_v53 = vmul.f32 %v1752_v30, %v809_v38 }
 0x154   :  { %1315 = vrsqrt.f32 %v934_v3  ;;  %v935_v50 = vadd.f32 1e-30, %v2141_v27  ;;  %v2150_v39 = vadd.f32 %v904_v10, %v2059_v40  ;;  %v765_v37 = vrot.slane %v468_v20, 2 }
 0x155   :  { %v767_v58 = vrot.slane %v469_v12, 2  ;;  %v768_v0 = vrot.slane %v470_v48, 2  ;;  %vm980_vm7 = vcmp.gt.f32.partialorder %v2097_v13, 1.0  ;;  %v471_v32 = vadd.f32 %v447_v29, %v1928_v63  ;;  %v394_v29 = vpop.permute.xlu0 %393 }
 0x156   :  { %v1310_v21 = vpop.eup %1309  ;;  %1317 = vrsqrt.f32 %v935_v50  ;;  %v936_v46 = vadd.f32 1e-30, %v2150_v39  ;;  %vm981_vm8 = vcmp.gt.f32.partialorder %v2120_v56, 1.0  ;;  %v905_v40 = vmul.f32 %v873_v53, %v873_v53 }
 0x157   :  { %v1312_v8 = vpop.eup %1311  ;;  %v963_v57 = vmul.f32 %v1310_v21, %v2094_v14  ;;  %v766_v30 = vsel %vm650_vm5, %v763_v6, %v765_v37  ;;  %v769_v36 = vsel %vm650_vm5, %v767_v58, %v768_v0  ;;  %v770_v43 = vrot.slane %v471_v32, 2 }
 0x158   :  { %v964_v28 = vmul.f32 %v1312_v8, %v2097_v13  ;;  %1319 = vrsqrt.f32 %v936_v46  ;;  %v810_v59 = vsub.f32 %v467_v5, %v766_v30  ;;  %v811_v26 = vsub.f32 %v469_v12, %v769_v36  ;;  %v396_v13 = vpop.permute.xlu1 %395 }
 0x159   :  { %v2163_v18 = vsel %vm979_vm6, %v1310_v21, %v963_v57  ;;  %v2166_v63 = vadd.f32 %v905_v40, %v2072_v55  ;;  %v448_v54 = vadd.f32 %v392_v16, %v2610_v45  ;;  %vm982_vm9 = vcmp.gt.f32.partialorder %v2123_v15, 1.0 }
 0x15a   :  { %v2171_v6 = vmul.f32 %v2163_v18, %v2163_v18  ;;  %v2175_v62 = vsel %vm980_vm7, %v1312_v8, %v964_v28  ;;  %v874_v5 = vmul.f32 %v1750_v23, %v810_v59  ;;  %v875_v24 = vmul.f32 %v1767_v31, %v811_v26  ;;  %v2611_v31 = vld [vmem:[#allocation39_spill] sm:$0xff] }
 0x15b   :  { %v2181_v3 = vmul.f32 %v2175_v62, %v2175_v62  ;;  %v937_v55 = vadd.f32 1e-30, %v2166_v63  ;;  %v771_v10 = vsel %vm650_vm5, %v768_v0, %v770_v43  ;;  %vm983_vm10 = vcmp.gt.f32.partialorder %v2141_v27, 1.0 }
 0x15c   :  { %v1027_v38 = vmul.f32 -0.0117212, %v2171_v6  ;;  %v906_v33 = vmul.f32 %v874_v5, %v874_v5  ;;  %v907_v20 = vmul.f32 %v875_v24, %v875_v24  ;;  %v812_v47 = vsub.f32 %v470_v48, %v771_v10 }
 0x15d   :  { %v1314_v12 = vpop.eup %1313  ;;  %v1028_v23 = vmul.f32 -0.0117212, %v2181_v3  ;;  %1321 = vrsqrt.f32 %v937_v55  ;;  %v2190_v60 = vadd.f32 %v448_v54, %v2611_v31  ;;  %vm984_vm11 = vcmp.gt.f32.partialorder %v2150_v39, 1.0 }
 0x15e   :  { %v1316_v50 = vpop.eup %1315  ;;  %v1043_v53 = vadd.f32 0.05265332, %v1027_v38  ;;  %v965_v37 = vmul.f32 %v1314_v12, %v2120_v56  ;;  %v2194_v58 = vadd.f32 %v906_v33, %v2089_v49  ;;  %v2197_v0 = vadd.f32 %v907_v20, %v2104_v9 }
 0x15f   :  { %v1044_v48 = vadd.f32 0.05265332, %v1028_v23  ;;  %v966_v21 = vmul.f32 %v1316_v50, %v2123_v15  ;;  %v876_v46 = vmul.f32 %v1771_v4, %v812_v47  ;;  %v449_v57 = vadd.f32 %v394_v29, %v1923_v22 }
 0x160   :  { %v1318_v32 = vpop.eup %1317  ;;  %v1059_v16 = vmul.f32 %v1043_v53, %v2171_v6  ;;  %v2205_v8 = vsel %vm981_vm8, %v1314_v12, %v965_v37  ;;  %v938_v49 = vadd.f32 1e-30, %v2194_v58  ;;  %v939_v22 = vadd.f32 1e-30, %v2197_v0  ;;  %v2612_v37 = vld [vmem:[#allocation40_spill] sm:$0xff] }
 0x161   :  { %v1060_v9 = vmul.f32 %v1044_v48, %v2181_v3  ;;  %v2212_v40 = vmul.f32 %v2205_v8, %v2205_v8  ;;  %v2216_v4 = vsel %vm982_vm9, %v1316_v50, %v966_v21  ;;  %v967_v30 = vmul.f32 %v1318_v32, %v2141_v27  ;;  %v2615_v27 = vld [vmem:[#allocation41_spill] sm:$0xff] }
 0x162   :  { %v1320_v36 = vpop.eup %1319  ;;  %v1075_v28 = vadd.f32 -0.11643287, %v1059_v16  ;;  %v2221_v59 = vmul.f32 %v2216_v4, %v2216_v4  ;;  %1323 = vrsqrt.f32 %v938_v49  ;;  %vm985_vm12 = vcmp.gt.f32.partialorder %v2166_v63, 1.0 }
 0x163   :  { %v1076_v26 = vadd.f32 -0.11643287, %v1060_v9  ;;  %v1029_v43 = vmul.f32 -0.0117212, %v2212_v40  ;;  %v2227_v45 = vsel %vm983_vm10, %v1318_v32, %v967_v30  ;;  %v968_v54 = vmul.f32 %v1320_v36, %v2150_v39 }
 0x164   :  { %v1091_v5 = vmul.f32 %v1075_v28, %v2171_v6  ;;  %v1030_v24 = vmul.f32 -0.0117212, %v2221_v59  ;;  %v2234_v55 = vmul.f32 %v2227_v45, %v2227_v45  ;;  %1325 = vrsqrt.f32 %v939_v22 }
 0x165   :  { %v1092_v10 = vmul.f32 %v1076_v26, %v2181_v3  ;;  %v1045_v38 = vadd.f32 0.05265332, %v1029_v43  ;;  %v2240_v33 = vsel %vm984_vm11, %v1320_v36, %v968_v54  ;;  %vm986_vm13 = vcmp.gt.f32.partialorder %v2194_v58, 1.0 }
 0x166   :  { %v1107_v20 = vadd.f32 0.19354346, %v1091_v5  ;;  %v1046_v47 = vadd.f32 0.05265332, %v1030_v24  ;;  %v1031_v12 = vmul.f32 -0.0117212, %v2234_v55  ;;  %v2245_v23 = vmul.f32 %v2240_v33, %v2240_v33 }
 0x167   :  { %v1322_v31 = vpop.eup %1321  ;;  %v1108_v29 = vadd.f32 0.19354346, %v1092_v10  ;;  %v1061_v50 = vmul.f32 %v1045_v38, %v2212_v40  ;;  %v908_v53 = vmul.f32 %v876_v46, %v876_v46  ;;  %v2250_v48 = vadd.f32 %v449_v57, %v2612_v37 }
 0x168   :  { %v1123_v21 = vmul.f32 %v1107_v20, %v2171_v6  ;;  %v1062_v32 = vmul.f32 %v1046_v47, %v2221_v59  ;;  %v1047_v16 = vadd.f32 0.05265332, %v1031_v12  ;;  %v1032_v49 = vmul.f32 -0.0117212, %v2245_v23 }
 0x169   :  { %v1124_v9 = vmul.f32 %v1108_v29, %v2181_v3  ;;  %v1077_v30 = vadd.f32 -0.11643287, %v1061_v50  ;;  %v969_v36 = vmul.f32 %v1322_v31, %v2166_v63  ;;  %v2258_v28 = vadd.f32 %v908_v53, %v2108_v42 }
 0x16a   :  { %v1139_v46 = vadd.f32 -0.33262348, %v1123_v21  ;;  %v1078_v22 = vadd.f32 -0.11643287, %v1062_v32  ;;  %v1063_v57 = vmul.f32 %v1047_v16, %v2234_v55  ;;  %v1048_v26 = vadd.f32 0.05265332, %v1032_v49 }
 0x16b   :  { %v1140_v43 = vadd.f32 -0.33262348, %v1124_v9  ;;  %v1093_v54 = vmul.f32 %v1077_v30, %v2212_v40  ;;  %v2264_v5 = vsel %vm985_vm12, %v1322_v31, %v969_v36  ;;  %v940_v24 = vadd.f32 1e-30, %v2258_v28 }
 0x16c   :  { %v1324_v10 = vpop.eup %1323  ;;  %v1155_v38 = vmul.f32 %v1139_v46, %v2171_v6  ;;  %v1094_v42 = vmul.f32 %v1078_v22, %v2221_v59  ;;  %v1079_v20 = vadd.f32 -0.11643287, %v1063_v57  ;;  %v1064_v47 = vmul.f32 %v1048_v26, %v2245_v23 }
 0x16d   :  { %v1156_v12 = vmul.f32 %v1140_v43, %v2181_v3  ;;  %v1109_v29 = vadd.f32 0.19354346, %v1093_v54  ;;  %v2273_v50 = vmul.f32 %v2264_v5, %v2264_v5  ;;  %v970_v31 = vmul.f32 %v1324_v10, %v2194_v58 }
 0x16e   :  { %v1171_v53 = vadd.f32 0.99997723, %v1155_v38  ;;  %v1110_v37 = vadd.f32 0.19354346, %v1094_v42  ;;  %v1095_v21 = vmul.f32 %v1079_v20, %v2234_v55  ;;  %v1080_v32 = vadd.f32 -0.11643287, %v1064_v47  ;;  %v1326_v6 = vpop.eup %1325 }
 0x16f   :  { %v1172_v16 = vadd.f32 0.99997723, %v1156_v12  ;;  %v1125_v49 = vmul.f32 %v1109_v29, %v2212_v40  ;;  %v1033_v9 = vmul.f32 -0.0117212, %v2273_v50  ;;  %v2281_v3 = vsel %vm986_vm13, %v1324_v10, %v970_v31 }
 0x170   :  { %vm987_vm15 = vcmp.gt.f32.partialorder %v2197_v0, 1.0  ;;  %v1187_v30 = vmul.f32 %v1171_v53, %v2163_v18  ;;  %v1126_v36 = vmul.f32 %v1110_v37, %v2221_v59  ;;  %v1111_v46 = vadd.f32 0.19354346, %v1095_v21 }
 0x171   :  { %v1096_v22 = vmul.f32 %v1080_v32, %v2245_v23  ;;  %v1188_v57 = vmul.f32 %v1172_v16, %v2175_v62  ;;  %v1141_v26 = vadd.f32 -0.33262348, %v1125_v49  ;;  %v1049_v43 = vadd.f32 0.05265332, %v1033_v9 }
 0x172   :  { %v2290_v54 = vmul.f32 %v2281_v3, %v2281_v3  ;;  %v1203_v38 = vsub.f32 1.5707964, %v1187_v30  ;;  %v1142_v10 = vadd.f32 -0.33262348, %v1126_v36  ;;  %v1127_v42 = vmul.f32 %v1111_v46, %v2234_v55 }
 0x173   :  { %v1112_v20 = vadd.f32 0.19354346, %v1096_v22  ;;  %v1204_v47 = vsub.f32 1.5707964, %v1188_v57  ;;  %v1157_v18 = vmul.f32 %v1141_v26, %v2212_v40  ;;  %v1065_v12 = vmul.f32 %v1049_v43, %v2273_v50 }
 0x174   :  { %v1034_v29 = vmul.f32 -0.0117212, %v2290_v54  ;;  %v1219_v62 = vsel %vm979_vm6, %v1203_v38, %v1187_v30  ;;  %v1158_v31 = vmul.f32 %v1142_v10, %v2221_v59  ;;  %v1143_v53 = vadd.f32 -0.33262348, %v1127_v42 }
 0x175   :  { %v1128_v37 = vmul.f32 %v1112_v20, %v2245_v23  ;;  %1236 = vst.msk [vmem:[#allocation6] sm:$0xff] %vm1235_vm14, %v1219_v62  ;;  %v1220_v21 = vsel %vm980_vm7, %v1204_v47, %v1188_v57  ;;  %v1173_v32 = vadd.f32 0.99997723, %v1157_v18  ;;  %v1081_v16 = vadd.f32 -0.11643287, %v1065_v12  ;;  %v398_v12 = vpop.permute.xlu0 %397 }
 0x176   :  { %v1050_v40 = vadd.f32 0.05265332, %v1034_v29  ;;  %1237 = vst.msk [vmem:[#allocation6 + $0x8] sm:$0xff] %vm1235_vm14, %v1220_v21  ;;  %v1174_v49 = vadd.f32 0.99997723, %v1158_v31  ;;  %v1159_v9 = vmul.f32 %v1143_v53, %v2234_v55  ;;  %v971_v30 = vmul.f32 %v1326_v6, %v2197_v0  ;;  %v2613_v21 = vld [vmem:[#allocation9_spill] sm:$0xff] }
 0x177   :  { %v1144_v14 = vadd.f32 -0.33262348, %v1128_v37  ;;  %v1189_v59 = vmul.f32 %v1173_v32, %v2205_v8  ;;  %v1097_v36 = vmul.f32 %v1081_v16, %v2273_v50  ;;  %1327 = vrsqrt.f32 %v940_v24  ;;  %v400_v16 = vpop.permute.xlu1 %399 }
 0x178   :  { %v1066_v46 = vmul.f32 %v1050_v40, %v2290_v54  ;;  %v1190_v22 = vmul.f32 %v1174_v49, %v2216_v4  ;;  %v1175_v57 = vadd.f32 0.99997723, %v1159_v9  ;;  %v2313_v43 = vsel %vm987_vm15, %v1326_v6, %v971_v30  ;;  %v2614_v9 = vld [vmem:[#allocation10_spill] sm:$0xff] }
 0x179   :  { %v1160_v26 = vmul.f32 %v1144_v14, %v2245_v23  ;;  %v1205_v55 = vsub.f32 1.5707964, %v1189_v59  ;;  %v1113_v38 = vadd.f32 0.19354346, %v1097_v36  ;;  %v2317_v8 = vmul.f32 %v2313_v43, %v2313_v43 }
 0x17a   :  { %v1082_v10 = vadd.f32 -0.11643287, %v1066_v46  ;;  %v1206_v42 = vsub.f32 1.5707964, %v1190_v22  ;;  %v1191_v24 = vmul.f32 %v1175_v57, %v2227_v45  ;;  %v772_v4 = vrot.slane %v2190_v60, 2 }
 0x17b   :  { %v1176_v20 = vadd.f32 0.99997723, %v1160_v26  ;;  %v1221_v23 = vsel %vm981_vm8, %v1205_v55, %v1189_v59  ;;  %v1129_v47 = vmul.f32 %v1113_v38, %v2273_v50  ;;  %v1035_v18 = vmul.f32 -0.0117212, %v2317_v8  ;;  %v2617_v26 = vld [vmem:[#allocation11_spill] sm:$0xff] }
 0x17c   :  { %v1098_v6 = vmul.f32 %v1082_v10, %v2290_v54  ;;  %vm988_vm0 = vcmp.gt.f32.partialorder %v2258_v28, 1.0  ;;  %1238 = vst.msk [vmem:[#allocation6 + $0x10] sm:$0xff] %vm1235_vm14, %v1221_v23  ;;  %v1222_v45 = vsel %vm982_vm9, %v1206_v42, %v1190_v22  ;;  %v1207_v29 = vsub.f32 1.5707964, %v1191_v24  ;;  %v2616_v22 = vld [vmem:[#allocation42_spill] sm:$0xff] }
 0x17d   :  { %v1192_v62 = vmul.f32 %v1176_v20, %v2240_v33  ;;  %v773_v56 = vrot.slane %v2250_v48, 2  ;;  %1239 = vst.msk [vmem:[#allocation6 + $0x18] sm:$0xff] %vm1235_vm14, %v1222_v45  ;;  %v1145_v31 = vadd.f32 -0.33262348, %v1129_v47  ;;  %v1051_v37 = vadd.f32 0.05265332, %v1035_v18 }
 0x17e   :  { %v1114_v53 = vadd.f32 0.19354346, %v1098_v6  ;;  %v450_v32 = vadd.f32 %v396_v13, %v2613_v21  ;;  %v1223_v40 = vsel %vm983_vm10, %v1207_v29, %v1191_v24  ;;  %v451_v14 = vadd.f32 %v398_v12, %v2614_v9  ;;  %v2618_v24 = vld [vmem:[#allocation26_spill] sm:$0xff]  ;;  %v2619_v47 = vld [vmem:[#allocation43_spill] sm:$0xff]  ;;  %v2621_v9 = vld [vmem:[#allocation44_spill] sm:$0xff] }
 0x17f   :  { %v1208_v49 = vsub.f32 1.5707964, %v1192_v62  ;;  %v774_v15 = vsel %vm650_vm5, %v772_v4, %v773_v56  ;;  %1240 = vst.msk [vmem:[#allocation6 + $0x20] sm:$0xff] %vm1235_vm14, %v1223_v40  ;;  %v1161_v33 = vmul.f32 %v1145_v31, %v2273_v50  ;;  %v1067_v59 = vmul.f32 %v1051_v37, %v2317_v8  ;;  %v402_v4 = vpop.permute.xlu0 %401  ;;  %v2620_v37 = vld [vmem:[#allocation12_spill] sm:$0xff] }
 0x180   :  { %v1130_v30 = vmul.f32 %v1114_v53, %v2290_v54  ;;  %v813_v36 = vsub.f32 %v2190_v60, %v774_v15  ;;  %v474_v13 = vadd.f32 %v450_v32, %v2615_v27  ;;  %v475_v57 = vadd.f32 %v451_v14, %v2616_v22 }
 0x181   :  { %v1224_v46 = vsel %vm984_vm11, %v1208_v49, %v1192_v62  ;;  %v452_v55 = vadd.f32 %v400_v16, %v2617_v26  ;;  %v1328_v38 = vpop.eup %1327  ;;  %v1177_v10 = vadd.f32 0.99997723, %v1161_v33  ;;  %v1083_v42 = vadd.f32 -0.11643287, %v1067_v59 }
 0x182   :  { %1241 = vst.msk [vmem:[#allocation6 + $0x28] sm:$0xff] %vm1235_vm14, %v1224_v46  ;;  %v1146_v50 = vadd.f32 -0.33262348, %v1130_v30  ;;  %v877_v20 = vmul.f32 %v2618_v24, %v813_v36  ;;  %v972_v60 = vmul.f32 %v1328_v38, %v2258_v28  ;;  %v775_v23 = vrot.slane %v474_v13, 2 }
 0x183   :  { %v777_v39 = vrot.slane %v475_v57, 2  ;;  %v476_v6 = vadd.f32 %v452_v55, %v2619_v47  ;;  %v1193_v18 = vmul.f32 %v1177_v10, %v2264_v5  ;;  %v1099_v45 = vmul.f32 %v1083_v42, %v2317_v8 }
 0x184   :  { %v1162_v12 = vmul.f32 %v1146_v50, %v2290_v54  ;;  %v909_v29 = vmul.f32 %v877_v20, %v877_v20  ;;  %v2357_v62 = vsel %vm988_vm0, %v1328_v38, %v972_v60  ;;  %v776_v31 = vsel %vm650_vm5, %v773_v56, %v775_v23  ;;  %v404_v56 = vpop.permute.xlu1 %403 }
 0x185   :  { %v778_v53 = vrot.slane %v476_v6, 2  ;;  %v453_v21 = vadd.f32 %v402_v4, %v2620_v37  ;;  %v1209_v32 = vsub.f32 1.5707964, %v1193_v18  ;;  %v1115_v40 = vadd.f32 0.19354346, %v1099_v45  ;;  %v2623_v4 = vld [vmem:[#allocation13_spill] sm:$0xff] }
 0x186   :  { %v1178_v16 = vadd.f32 0.99997723, %v1162_v12  ;;  %v2363_v5 = vmul.f32 %v2357_v62, %v2357_v62  ;;  %v2366_v54 = vadd.f32 %v909_v29, %v2132_v1  ;;  %v814_v49 = vsub.f32 %v2250_v48, %v776_v31  ;;  %v2624_v12 = vld [vmem:[#allocation46_spill] sm:$0xff] }
 0x187   :  { %v779_v15 = vsel %vm650_vm5, %v777_v39, %v778_v53  ;;  %v477_v14 = vadd.f32 %v453_v21, %v2621_v9  ;;  %v1225_v33 = vsel %vm985_vm12, %v1209_v32, %v1193_v18  ;;  %v1131_v59 = vmul.f32 %v1115_v40, %v2317_v8 }
 0x188   :  { %v1194_v30 = vmul.f32 %v1178_v16, %v2281_v3  ;;  %v1036_v36 = vmul.f32 -0.0117212, %v2363_v5  ;;  %v895_v1 = vmul.f32 %v2044_v41, %v2044_v41  ;;  %1242 = vst.msk [vmem:[#allocation6 + $0x30] sm:$0xff] %vm1235_vm14, %v1225_v33  ;;  %v941_v48 = vadd.f32 1e-30, %v2366_v54  ;;  %v406_v3 = vpop.permute.xlu0 %405  ;;  %v408_v60 = vpop.permute.xlu1 %407 }
 0x189   :  { %v878_v46 = vmul.f32 %v1787_v35, %v814_v49  ;;  %v815_v27 = vsub.f32 %v475_v57, %v779_v15  ;;  %v1147_v22 = vadd.f32 -0.33262348, %v1131_v59  ;;  %v454_v26 = vadd.f32 %v404_v56, %v1597_v61  ;;  %v2622_v35 = vld [vmem:[#allocation45_spill] sm:$0xff] }
 0x18a   :  { %v1210_v13 = vsub.f32 1.5707964, %v1194_v30  ;;  %v1052_v63 = vadd.f32 0.05265332, %v1036_v36  ;;  %1329 = vrsqrt.f32 %v941_v48  ;;  %v780_v10 = vrot.slane %v477_v14, 2 }
 0x18b   :  { %v910_v55 = vmul.f32 %v878_v46, %v878_v46  ;;  %v879_v38 = vmul.f32 %v1803_v51, %v815_v27  ;;  %v1163_v50 = vmul.f32 %v1147_v22, %v2317_v8  ;;  %v478_v57 = vadd.f32 %v454_v26, %v2622_v35 }
 0x18c   :  { %v1226_v41 = vsel %vm986_vm13, %v1210_v13, %v1194_v30  ;;  %v1068_v42 = vmul.f32 %v1052_v63, %v2363_v5  ;;  %v781_v20 = vsel %vm650_vm5, %v778_v53, %v780_v10  ;;  %v455_v51 = vadd.f32 %v406_v3, %v2623_v4 }
 0x18d   :  { %1243 = vst.msk [vmem:[#allocation6 + $0x38] sm:$0xff] %vm1235_vm14, %v1226_v41  ;;  %v2390_v24 = vadd.f32 %v910_v55, %v2136_v2  ;;  %v911_v61 = vmul.f32 %v879_v38, %v879_v38  ;;  %v1179_v23 = vadd.f32 0.99997723, %v1163_v50  ;;  %v816_v39 = vsub.f32 %v476_v6, %v781_v20 }
 0x18e   :  { %v1084_v58 = vadd.f32 -0.11643287, %v1068_v42  ;;  %v782_v18 = vrot.slane %v478_v57, 2  ;;  %v479_v45 = vadd.f32 %v455_v51, %v2624_v12  ;;  %v456_v53 = vadd.f32 %v408_v60, %v1610_v17 }
 0x18f   :  { %v942_v8 = vadd.f32 1e-30, %v2390_v24  ;;  %v2395_v47 = vadd.f32 %v911_v61, %v895_v1  ;;  %v1195_v29 = vmul.f32 %v1179_v23, %v2313_v43  ;;  %v880_v31 = vmul.f32 %v1815_v25, %v816_v39 }
 0x190   :  { %v1100_v2 = vmul.f32 %v1084_v58, %v2363_v5  ;;  %v896_v37 = vmul.f32 %v2047_v34, %v2047_v34  ;;  %v783_v21 = vrot.slane %v479_v45, 2  ;;  %v480_v49 = vadd.f32 %v456_v53, %v2034_v19 }
 0x191   :  { %1331 = vrsqrt.f32 %v942_v8  ;;  %v943_v6 = vadd.f32 1e-30, %v2395_v47  ;;  %v1211_v32 = vsub.f32 1.5707964, %v1195_v29  ;;  %v912_v40 = vmul.f32 %v880_v31, %v880_v31 }
 0x192   :  { %v1116_v16 = vadd.f32 0.19354346, %v1100_v2  ;;  %v784_v43 = vsel %vm650_vm5, %v782_v18, %v783_v21  ;;  %v785_v14 = vrot.slane %v480_v49, 2  ;;  %vm989_vm1 = vcmp.gt.f32.partialorder %v2366_v54, 1.0 }
 0x193   :  { %1333 = vrsqrt.f32 %v943_v6  ;;  %v1227_v25 = vsel %vm987_vm15, %v1211_v32, %v1195_v29  ;;  %v2410_v15 = vadd.f32 %v912_v40, %v896_v37  ;;  %v817_v34 = vsub.f32 %v478_v57, %v784_v43 }
 0x194   :  { %v1132_v17 = vmul.f32 %v1116_v16, %v2363_v5  ;;  %v1330_v9 = vpop.eup %1329  ;;  %1244 = vst.msk [vmem:[#allocation6 + $0x40] sm:$0xff] %vm1235_vm14, %v1227_v25  ;;  %v786_v0 = vsel %vm650_vm5, %v783_v21, %v785_v14  ;;  %v897_v48 = vmul.f32 %v2062_v44, %v2062_v44  ;;  %vm990_vm2 = vcmp.gt.f32.partialorder %v2390_v24, 1.0 }
 0x195   :  { %v973_v33 = vmul.f32 %v1330_v9, %v2366_v54  ;;  %v944_v19 = vadd.f32 1e-30, %v2410_v15  ;;  %v881_v30 = vmul.f32 %v2019_v52, %v817_v34  ;;  %v818_v1 = vsub.f32 %v479_v45, %v786_v0 }
 0x196   :  { %v1148_v56 = vadd.f32 -0.33262348, %v1132_v17  ;;  %vm991_vm3 = vcmp.gt.f32.partialorder %v2395_v47, 1.0  ;;  %vm992_vm4 = vcmp.gt.f32.partialorder %v2410_v15, 1.0 }
 0x197   :  { %v2421_v36 = vsel %vm989_vm1, %v1330_v9, %v973_v33  ;;  %1335 = vrsqrt.f32 %v944_v19  ;;  %v913_v27 = vmul.f32 %v881_v30, %v881_v30  ;;  %v882_v52 = vmul.f32 %v2010_v11, %v818_v1 }
 0x198   :  { %v1164_v59 = vmul.f32 %v1148_v56, %v2363_v5  ;;  %v1021_v46 = vmul.f32 %v2421_v36, %v2421_v36  ;;  %v898_v5 = vmul.f32 %v2082_v7, %v2082_v7 }
 0x199   :  { %v2428_v26 = vadd.f32 %v913_v27, %v897_v48  ;;  %v914_v38 = vmul.f32 %v882_v52, %v882_v52 }
 0x19a   :  { %v1180_v13 = vadd.f32 0.99997723, %v1164_v59  ;;  %v1037_v63 = vmul.f32 -0.0117212, %v1021_v46 }
 0x19b   :  { %v1332_v22 = vpop.eup %1331  ;;  %v945_v41 = vadd.f32 1e-30, %v2428_v26  ;;  %v2441_v35 = vadd.f32 %v914_v38, %v898_v5  ;;  %vm993_vm5 = vcmp.gt.f32.partialorder %v2428_v26, 1.0 }
 0x19c   :  { %v1196_v3 = vmul.f32 %v1180_v13, %v2357_v62  ;;  %v974_v55 = vmul.f32 %v1332_v22, %v2390_v24  ;;  %v1053_v10 = vadd.f32 0.05265332, %v1037_v63 }
 0x19d   :  { %v1334_v44 = vpop.eup %1333  ;;  %1337 = vrsqrt.f32 %v945_v41  ;;  %v946_v20 = vadd.f32 1e-30, %v2441_v35  ;;  %vm994_vm6 = vcmp.gt.f32.partialorder %v2441_v35, 1.0 }
 0x19e   :  { %v1212_v50 = vsub.f32 1.5707964, %v1196_v3  ;;  %v2438_v11 = vsel %vm990_vm2, %v1332_v22, %v974_v55  ;;  %v975_v42 = vmul.f32 %v1334_v44, %v2395_v47  ;;  %v1069_v7 = vmul.f32 %v1053_v10, %v1021_v46 }
 0x19f   :  { %v1022_v62 = vmul.f32 %v2438_v11, %v2438_v11  ;;  %1339 = vrsqrt.f32 %v946_v20 }
 0x1a0   :  { %v1228_v57 = vsel %vm988_vm0, %v1212_v50, %v1196_v3  ;;  %v2450_v61 = vsel %vm991_vm3, %v1334_v44, %v975_v42  ;;  %v1085_v4 = vadd.f32 -0.11643287, %v1069_v7 }
 0x1a1   :  { %1245 = vst.msk [vmem:[#allocation6 + $0x48] sm:$0xff] %vm1235_vm14, %v1228_v57  ;;  %v1038_v51 = vmul.f32 -0.0117212, %v1022_v62  ;;  %v1023_v60 = vmul.f32 %v2450_v61, %v2450_v61  ;;  %v1336_v23 = vpop.eup %1335 }
 0x1a2   :  { %v1101_v58 = vmul.f32 %v1085_v4, %v1021_v46  ;;  %v976_v28 = vmul.f32 %v1336_v23, %v2410_v15 }
 0x1a3   :  { %v1054_v39 = vadd.f32 0.05265332, %v1038_v51  ;;  %v1039_v8 = vmul.f32 -0.0117212, %v1023_v60 }
 0x1a4   :  { %v1117_v18 = vadd.f32 0.19354346, %v1101_v58  ;;  %v2460_v29 = vsel %vm992_vm4, %v1336_v23, %v976_v28 }
 0x1a5   :  { %v1070_v12 = vmul.f32 %v1054_v39, %v1022_v62  ;;  %v1055_v45 = vadd.f32 0.05265332, %v1039_v8  ;;  %v1024_v2 = vmul.f32 %v2460_v29, %v2460_v29 }
 0x1a6   :  { %v1133_v31 = vmul.f32 %v1117_v18, %v1021_v46 }
 0x1a7   :  { %v1086_v53 = vadd.f32 -0.11643287, %v1070_v12  ;;  %v1071_v37 = vmul.f32 %v1055_v45, %v1023_v60  ;;  %v1040_v6 = vmul.f32 -0.0117212, %v1024_v2  ;;  %v1338_v21 = vpop.eup %1337 }
 0x1a8   :  { %v1149_v32 = vadd.f32 -0.33262348, %v1133_v31  ;;  %v977_v43 = vmul.f32 %v1338_v21, %v2428_v26 }
 0x1a9   :  { %v1102_v16 = vmul.f32 %v1086_v53, %v1022_v62  ;;  %v1087_v40 = vadd.f32 -0.11643287, %v1071_v37  ;;  %v1056_v49 = vadd.f32 0.05265332, %v1040_v6  ;;  %v1340_v9 = vpop.eup %1339 }
 0x1aa   :  { %v1165_v25 = vmul.f32 %v1149_v32, %v1021_v46  ;;  %v1009_v56 = vsel %vm993_vm5, %v1338_v21, %v977_v43  ;;  %v978_v1 = vmul.f32 %v1340_v9, %v2441_v35 }
 0x1ab   :  { %v1118_v17 = vadd.f32 0.19354346, %v1102_v16  ;;  %v1103_v34 = vmul.f32 %v1087_v40, %v1023_v60  ;;  %v1072_v14 = vmul.f32 %v1056_v49, %v1024_v2  ;;  %v1025_v0 = vmul.f32 %v1009_v56, %v1009_v56 }
 0x1ac   :  { %v1181_v33 = vadd.f32 0.99997723, %v1165_v25  ;;  %v1010_v22 = vsel %vm994_vm6, %v1340_v9, %v978_v1 }
 0x1ad   :  { %v1134_v19 = vmul.f32 %v1118_v17, %v1022_v62  ;;  %v1119_v30 = vadd.f32 0.19354346, %v1103_v34  ;;  %v1088_v59 = vadd.f32 -0.11643287, %v1072_v14  ;;  %v1041_v13 = vmul.f32 -0.0117212, %v1025_v0 }
 0x1ae   :  { %v1197_v48 = vmul.f32 %v1181_v33, %v2421_v36  ;;  %v1026_v44 = vmul.f32 %v1010_v22, %v1010_v22 }
 0x1af   :  { %v1150_v46 = vadd.f32 -0.33262348, %v1134_v19  ;;  %v1135_v27 = vmul.f32 %v1119_v30, %v1023_v60  ;;  %v1104_v52 = vmul.f32 %v1088_v59, %v1024_v2  ;;  %v1057_v55 = vadd.f32 0.05265332, %v1041_v13 }
 0x1b0   :  { %v1213_v63 = vsub.f32 1.5707964, %v1197_v48  ;;  %v1042_v7 = vmul.f32 -0.0117212, %v1026_v44 }
 0x1b1   :  { %v1166_v5 = vmul.f32 %v1150_v46, %v1022_v62  ;;  %v1151_v3 = vadd.f32 -0.33262348, %v1135_v27  ;;  %v1120_v38 = vadd.f32 0.19354346, %v1104_v52  ;;  %v1073_v42 = vmul.f32 %v1057_v55, %v1025_v0 }
 0x1b2   :  { %v1229_v10 = vsel %vm989_vm1, %v1213_v63, %v1197_v48  ;;  %v1058_v62 = vadd.f32 0.05265332, %v1042_v7 }
 0x1b3   :  { %v1182_v41 = vadd.f32 0.99997723, %v1166_v5  ;;  %v1167_v50 = vmul.f32 %v1151_v3, %v1023_v60  ;;  %1246 = vst.msk [vmem:[#allocation6 + $0x50] sm:$0xff] %vm1235_vm14, %v1229_v10  ;;  %v1136_v36 = vmul.f32 %v1120_v38, %v1024_v2  ;;  %v1089_v4 = vadd.f32 -0.11643287, %v1073_v42 }
 0x1b4   :  { %v1074_v54 = vmul.f32 %v1058_v62, %v1026_v44 }
 0x1b5   :  { %v1198_v57 = vmul.f32 %v1182_v41, %v2438_v11  ;;  %v1183_v20 = vadd.f32 0.99997723, %v1167_v50  ;;  %v1152_v51 = vadd.f32 -0.33262348, %v1136_v36  ;;  %v1105_v39 = vmul.f32 %v1089_v4, %v1025_v0 }
 0x1b6   :  { %v1090_v45 = vadd.f32 -0.11643287, %v1074_v54 }
 0x1b7   :  { %v1214_v23 = vsub.f32 1.5707964, %v1198_v57  ;;  %v1199_v58 = vmul.f32 %v1183_v20, %v2450_v61  ;;  %v1168_v8 = vmul.f32 %v1152_v51, %v1024_v2  ;;  %v1121_v18 = vadd.f32 0.19354346, %v1105_v39 }
 0x1b8   :  { %v1106_v53 = vmul.f32 %v1090_v45, %v1026_v44 }
 0x1b9   :  { %v1230_v60 = vsel %vm990_vm2, %v1214_v23, %v1198_v57  ;;  %v1215_v28 = vsub.f32 1.5707964, %v1199_v58  ;;  %v1184_v12 = vadd.f32 0.99997723, %v1168_v8  ;;  %v1137_v31 = vmul.f32 %v1121_v18, %v1025_v0 }
 0x1ba   :  { %1247 = vst.msk [vmem:[#allocation6 + $0x58] sm:$0xff] %vm1235_vm14, %v1230_v60  ;;  %v1122_v6 = vadd.f32 0.19354346, %v1106_v53 }
 0x1bb   :  { %v1231_v11 = vsel %vm991_vm3, %v1215_v28, %v1199_v58  ;;  %v1200_v61 = vmul.f32 %v1184_v12, %v2460_v29  ;;  %v1153_v2 = vadd.f32 -0.33262348, %v1137_v31 }
 0x1bc   :  { %1248 = vst.msk [vmem:[#allocation6 + $0x60] sm:$0xff] %vm1235_vm14, %v1231_v11  ;;  %v1138_v32 = vmul.f32 %v1122_v6, %v1026_v44 }
 0x1bd   :  { %v1216_v37 = vsub.f32 1.5707964, %v1200_v61  ;;  %v1169_v24 = vmul.f32 %v1153_v2, %v1025_v0 }
 0x1be   :  { %v1154_v40 = vadd.f32 -0.33262348, %v1138_v32 }
 0x1bf   :  { %v1232_v21 = vsel %vm992_vm4, %v1216_v37, %v1200_v61  ;;  %v1185_v16 = vadd.f32 0.99997723, %v1169_v24 }
 0x1c0   :  { %1249 = vst.msk [vmem:[#allocation6 + $0x68] sm:$0xff] %vm1235_vm14, %v1232_v21  ;;  %v1170_v49 = vmul.f32 %v1154_v40, %v1026_v44 }
 0x1c1   :  { %v1201_v47 = vmul.f32 %v1185_v16, %v1009_v56 }
 0x1c2   :  { %v1186_v25 = vadd.f32 0.99997723, %v1170_v49 }
 0x1c3   :  { %v1217_v43 = vsub.f32 1.5707964, %v1201_v47 }
 0x1c4   :  { %v1202_v17 = vmul.f32 %v1186_v25, %v1010_v22 }
 0x1c5   :  { %v1233_v29 = vsel %vm993_vm5, %v1217_v43, %v1201_v47 }
 0x1c6   :  { %1250 = vst.msk [vmem:[#allocation6 + $0x70] sm:$0xff] %vm1235_vm14, %v1233_v29  ;;  %v1218_v34 = vsub.f32 1.5707964, %v1202_v17 }
 0x1c8   :  { %v1234_v15 = vsel %vm994_vm6, %v1218_v34, %v1202_v17 }
 0x1c9   :  { %1251 = vst.msk [vmem:[#allocation6 + $0x78] sm:$0xff] %vm1235_vm14, %v1234_v15 }
 0x1ca   :  { %1374 = shalt.err (!%p1371_p12)
}
 0x1cb   :  { %s1375_s27 = scalar_lea.hbm %s2510_s1, 2048 }
 0x1cc   :  { %p1376_p13 = scmp.ne.s32.totalorder %s2510_s1, %s1375_s27  ;;  %p1379_p0 = scmp.lt.u32.totalorder %s1375_s27, %s2510_s1 }
 0x1ce   :  { %p1381_p1 = pnand %p1379_p0, %p1376_p13 }
 0x1d0   :  { %1384 = shalt.err (!%p1381_p1)
}
 0x1d1   :  { %1263 = dma.vmem_to_hbm [thread:$0]  %s1258_s23, 2048, %s2510_s1, [#allocation5], %s1390_s16, %s1390_s16, %s1391_s17  }
 0x1d2   :  { %1387 = dma.done.wait [#allocation5], 2048  }
 0x1d3   :  { %1388 = vsyncadd [#allocation5], 4294965248 }
 0x1d4   :  { %1267 = vsyncpa [#allocation4], 1 }
 0x1d5   :  { %1268 = vsyncpa [#allocation5], 1 }

</bundles_post_ra>
